<compile_context>
chip_gen: v7x
topology: tpu7x:2x2x1
jax: 0.10.0
libtpu: 0.0.40
codegen_flags: <defaults>
</compile_context>

<pallas_src>
import functools
import math

import jax
import jax.numpy as jnp
from jax import lax
from jax.experimental import pallas as pl
from jax.experimental.pallas import tpu as pltpu

# ----------------------------- config ---------------------------------------
NUM_STAGES = 3
NUM_FG_CLASSES = 4                 # cls head outputs NUM_FG_CLASSES + 1 (bg last)
N_CLS = NUM_FG_CLASSES + 1
ROI_SIZE = 7
FC_HIDDEN = 32
SPATIAL_SCALE = 0.25               # 16x16 feature map for a 64x64 image
BBOX_MEANS = (0.0, 0.0, 0.0, 0.0)
STAGE_STDS = (
    (0.1, 0.1, 0.2, 0.2),
    (0.05, 0.05, 0.1, 0.1),
    (0.033, 0.033, 0.067, 0.067),
)
MAX_PER_IMG = 5
SCORE_THR = 0.05
WH_RATIO_CLIP = 16.0 / 1000.0

# Lane layout of the fused per-stage output slab (lane-dense, width 128).
OUT_W = 128
COL_CLS = 0      # cls_score              -> columns [0, 5)
COL_REG = 8      # raw bbox_pred deltas   -> columns [8, 12)
COL_SM = 16      # softmax(cls_score)     -> columns [16, 21)
COL_BOX = 24     # decoded boxes          -> columns [24, 28)


# -------------------- Pallas kernel: fused cascade stage ---------------------
def stage_kernel(x_ref, rois_ref, w1_ref, b1_ref, w2_ref, b2_ref, wo_ref, bo_ref,
                 out_ref, *, means, stds, max_h, max_w, n_cls):
    """Fused: 2-FC head -> (cls|reg) matmul -> softmax + delta2bbox epilogue.

    x_ref:    (N, K_pad)  bf16 flattened roi features (K padded to 128-mult)
    rois_ref: (N, 4)      fp32 input boxes
    out_ref:  (N, 128)    fp32 slab: cls @0:5, reg @8:12, softmax @16:21,
                          decoded boxes @24:28, zeros elsewhere.
    """
    x = x_ref[...]                                                     # bf16
    h1 = jnp.dot(x, w1_ref[...], preferred_element_type=jnp.float32) + b1_ref[...]
    h1 = jnp.maximum(h1, 0.0)
    h2 = jnp.dot(h1.astype(jnp.bfloat16), w2_ref[...],
                 preferred_element_type=jnp.float32) + b2_ref[...]
    h2 = jnp.maximum(h2, 0.0)
    # Fused cls|reg projection, lane-dense 128-wide output.
    raw = jnp.dot(h2.astype(jnp.bfloat16), wo_ref[...],
                  preferred_element_type=jnp.float32) + bo_ref[...]    # (N, 128)

    cls = raw[:, COL_CLS:COL_CLS + n_cls]                              # (N, 5)
    reg = raw[:, COL_REG:COL_REG + 4]                                  # (N, 4)

    # ---- softmax over classes (fp32 on VPU/EUP) ----
    m = jnp.max(cls, axis=-1, keepdims=True)
    e = jnp.exp(cls - m)
    sm = e / jnp.sum(e, axis=-1, keepdims=True)                        # (N, 5)

    # ---- delta2bbox decode (fp32) ----
    rois = rois_ref[...]                                               # (N, 4)
    px = (rois[:, 0:1] + rois[:, 2:3]) * 0.5
    py = (rois[:, 1:2] + rois[:, 3:4]) * 0.5
    pw = rois[:, 2:3] - rois[:, 0:1]
    ph = rois[:, 3:4] - rois[:, 1:2]

    dx = reg[:, 0:1] * stds[0] + means[0]
    dy = reg[:, 1:2] * stds[1] + means[1]
    dw = reg[:, 2:3] * stds[2] + means[2]
    dh = reg[:, 3:4] * stds[3] + means[3]

    max_ratio = abs(math.log(WH_RATIO_CLIP))
    dw = jnp.clip(dw, -max_ratio, max_ratio)
    dh = jnp.clip(dh, -max_ratio, max_ratio)

    gw = pw * jnp.exp(dw)
    gh = ph * jnp.exp(dh)
    gx = px + pw * dx
    gy = py + ph * dy

    bx1 = jnp.clip(gx - gw * 0.5, 0.0, max_w)
    by1 = jnp.clip(gy - gh * 0.5, 0.0, max_h)
    bx2 = jnp.clip(gx + gw * 0.5, 0.0, max_w)
    by2 = jnp.clip(gy + gh * 0.5, 0.0, max_h)

    # Dense 128-lane store of the matmul slab, then tiny masked patches for
    # the epilogue results (everything else in the slab is already zero
    # because wo/bo are zero outside the cls/reg columns).
    out_ref[...] = raw
    out_ref[:, COL_SM:COL_SM + n_cls] = sm
    out_ref[:, COL_BOX + 0:COL_BOX + 1] = bx1
    out_ref[:, COL_BOX + 1:COL_BOX + 2] = by1
    out_ref[:, COL_BOX + 2:COL_BOX + 3] = bx2
    out_ref[:, COL_BOX + 3:COL_BOX + 4] = by2


def stage_pallas(x_bf16, rois, p, stds, img_shape):
    """x_bf16: (N, K_pad) bf16; rois: (N, 4) fp32. Returns (N, 128) fp32 slab."""
    n = x_bf16.shape[0]
    kernel = functools.partial(
        stage_kernel,
        means=tuple(float(m) for m in BBOX_MEANS),
        stds=tuple(float(s) for s in stds),
        max_h=float(img_shape[0]),
        max_w=float(img_shape[1]),
        n_cls=N_CLS,
    )
    # No grid: the whole roi batch is one block, all weights resident in VMEM.
    return pl.pallas_call(
        kernel,
        out_shape=jax.ShapeDtypeStruct((n, OUT_W), jnp.float32),
    )(x_bf16, rois, p["w1"], p["b1"], p["w2"], p["b2"], p["wo"], p["bo"])


# ----------------------- RoI Align (plain JAX glue) --------------------------
# TODO(synk): RoI-Align is a data-dependent bilinear gather with no clean Pallas
# TPU equivalent at these sizes; it is implemented with plain-JAX gathers here.
def roi_align_nhwc(feat_nhwc, rois, out_size, spatial_scale):
    """feat_nhwc: (B, H, W, C); rois: (N, 5) [batch_idx, x1, y1, x2, y2].

    Returns (N, out_size, out_size, C) — flattened in (h, w, c) order by caller.
    """
    _, h_dim, w_dim, _ = feat_nhwc.shape

    batch_idx = rois[:, 0].astype(jnp.int32)
    x1 = rois[:, 1] * spatial_scale - 0.5
    y1 = rois[:, 2] * spatial_scale - 0.5
    x2 = rois[:, 3] * spatial_scale - 0.5
    y2 = rois[:, 4] * spatial_scale - 0.5

    bin_w = (x2 - x1) / out_size
    bin_h = (y2 - y1) / out_size

    grid = jnp.arange(out_size, dtype=jnp.float32) + 0.5
    sx = x1[:, None] + grid[None, :] * bin_w[:, None]   # (N, S)
    sy = y1[:, None] + grid[None, :] * bin_h[:, None]   # (N, S)

    n = rois.shape[0]
    px = jnp.broadcast_to(sx[:, None, :], (n, out_size, out_size))
    py = jnp.broadcast_to(sy[:, :, None], (n, out_size, out_size))

    x0f = jnp.floor(px)
    y0f = jnp.floor(py)
    lx = px - x0f
    ly = py - y0f

    x0 = jnp.clip(x0f.astype(jnp.int32), 0, w_dim - 1)
    x1i = jnp.clip(x0f.astype(jnp.int32) + 1, 0, w_dim - 1)
    y0 = jnp.clip(y0f.astype(jnp.int32), 0, h_dim - 1)
    y1i = jnp.clip(y0f.astype(jnp.int32) + 1, 0, h_dim - 1)

    b = batch_idx[:, None, None]
    v00 = feat_nhwc[b, y0, x0]      # (N, S, S, C)
    v01 = feat_nhwc[b, y0, x1i]
    v10 = feat_nhwc[b, y1i, x0]
    v11 = feat_nhwc[b, y1i, x1i]

    w00 = ((1.0 - ly) * (1.0 - lx))[..., None]
    w01 = ((1.0 - ly) * lx)[..., None]
    w10 = (ly * (1.0 - lx))[..., None]
    w11 = (ly * lx)[..., None]

    return v00 * w00 + v01 * w01 + v10 * w10 + v11 * w11   # (N, S, S, C)


# ----------------------- parameter init --------------------------------------
def init_params(key, in_channels):
    """Weights: fc1/fc2/fused-out stored bf16 (MXU inputs), biases fp32.

    fc1 rows are generated in torch CHW-flatten order, permuted to the
    (h, w, c)-flatten order used by the kernel, and zero-padded so the
    contraction dim is a multiple of 128.
    """
    d_in = in_channels * ROI_SIZE * ROI_SIZE
    d_pad = ((d_in + 127) // 128) * 128
    stages = []
    for i in range(NUM_STAGES):
        k = jax.random.fold_in(key, i)
        k1, k2, k3, k4 = jax.random.split(k, 4)

        w1_chw = 0.05 * jax.random.normal(
            k1, (in_channels, ROI_SIZE, ROI_SIZE, FC_HIDDEN), jnp.float32)
        w1 = jnp.transpose(w1_chw, (1, 2, 0, 3)).reshape(d_in, FC_HIDDEN)
        w1 = jnp.pad(w1, ((0, d_pad - d_in), (0, 0)))

        w2 = 0.05 * jax.random.normal(k2, (FC_HIDDEN, FC_HIDDEN), jnp.float32)
        wc = 0.05 * jax.random.normal(k3, (FC_HIDDEN, N_CLS), jnp.float32)
        wr = 0.05 * jax.random.normal(k4, (FC_HIDDEN, 4), jnp.float32)  # reg_class_agnostic=True

        wo = jnp.zeros((FC_HIDDEN, OUT_W), jnp.float32)
        wo = wo.at[:, COL_CLS:COL_CLS + N_CLS].set(wc)
        wo = wo.at[:, COL_REG:COL_REG + 4].set(wr)
        bo = jnp.zeros((1, OUT_W), jnp.float32)

        stages.append(dict(
            w1=w1.astype(jnp.bfloat16),
            b1=jnp.zeros((1, FC_HIDDEN), jnp.float32),
            w2=w2.astype(jnp.bfloat16),
            b2=jnp.zeros((1, FC_HIDDEN), jnp.float32),
            wo=wo.astype(jnp.bfloat16),
            bo=bo,
        ))
    return stages


# ----------------------- cascade forward -------------------------------------
def cascade_roi_head_forward(feat, proposals, img_shape, params):
    """feat: (B, C, H, W) NCHW; proposals: (B, P, 4); img_shape: (h, w) floats."""
    batch_size, num_proposals, _ = proposals.shape
    n = batch_size * num_proposals
    d_pad = params[0]["w1"].shape[0]

    # NCHW -> NHWC once (hoisted out of the stage loop).
    feat_nhwc = jnp.transpose(feat, (0, 2, 3, 1))

    # rois_pad = arange_by_input(proposals, 0).repeat(...) -> per-roi batch index
    rois_pad = jnp.repeat(jnp.arange(batch_size, dtype=jnp.float32),
                          num_proposals).reshape(-1, 1)
    rois = proposals.reshape(-1, 4).astype(jnp.float32)

    slab = None
    for i in range(NUM_STAGES):
        rois5 = jnp.concatenate([rois_pad, rois], axis=1)                  # (N, 5)
        roi_feats = roi_align_nhwc(feat_nhwc, rois5, ROI_SIZE, SPATIAL_SCALE)
        x = roi_feats.reshape(n, -1)                                       # (N, 196) hwc-order
        x = jnp.pad(x, ((0, 0), (0, d_pad - x.shape[1])))                  # K -> 256
        x = x.astype(jnp.bfloat16)
        # Fused: bbox head + softmax + delta2bbox (this stage's coder stds).
        slab = stage_pallas(x, rois, params[i], STAGE_STDS[i], img_shape)  # (N, 128)
        rois = slab[:, COL_BOX:COL_BOX + 4]  # decoded boxes feed the next stage

    # ---- get_bboxes (last stage): cls/softmax/boxes already in the slab ----
    scores = slab[:, COL_SM:COL_SM + N_CLS]                                # (N, C+1)
    boxes = rois                                                           # (N, 4)

    scores_b = scores.reshape(batch_size, num_proposals, N_CLS)
    scores_fg = scores_b[..., :NUM_FG_CLASSES]                             # drop background (last col)
    boxes_b = boxes.reshape(batch_size, num_proposals, 4)

    # TODO(synk): TensorRT BatchedNMS plugin has no Pallas equivalent; per-image
    # top-k over (proposal, class) candidates is used instead of NMS.
    flat_scores = scores_fg.reshape(batch_size, num_proposals * NUM_FG_CLASSES)
    det_scores, topk_idx = lax.top_k(flat_scores, MAX_PER_IMG)
    prop_idx = topk_idx // NUM_FG_CLASSES
    det_classes = (topk_idx % NUM_FG_CLASSES).astype(jnp.int32)
    det_boxes = jnp.take_along_axis(boxes_b, prop_idx[..., None], axis=1)
    num_detections = jnp.sum(det_scores > SCORE_THR, axis=1).astype(jnp.int32)
    return num_detections, det_boxes, det_scores, det_classes


# ----------------------- main -------------------------------------------------
if __name__ == "__main__":
    key = jax.random.PRNGKey(0)
    k_feat, k_x, k_y, k_w, k_h, k_par = jax.random.split(key, 6)

    B, C, H, W = 2, 4, 16, 16
    P = 8
    img_shape = (64.0, 64.0)  # (height, width)

    feat = jax.random.normal(k_feat, (B, C, H, W), jnp.float32)

    px = jax.random.uniform(k_x, (B, P), minval=0.0, maxval=40.0)
    py = jax.random.uniform(k_y, (B, P), minval=0.0, maxval=40.0)
    pw = jax.random.uniform(k_w, (B, P), minval=8.0, maxval=20.0)
    ph = jax.random.uniform(k_h, (B, P), minval=8.0, maxval=20.0)
    proposals = jnp.stack(
        [px, py, jnp.minimum(px + pw, img_shape[1] - 1.0),
         jnp.minimum(py + ph, img_shape[0] - 1.0)], axis=-1)          # (B, P, 4)

    params = init_params(k_par, C)

    fwd = jax.jit(lambda f, p: cascade_roi_head_forward(f, p, img_shape, params))
    outs = fwd(feat, proposals)
    outs = jax.block_until_ready(outs)

    num_detections, det_boxes, det_scores, det_classes = outs
    assert num_detections.shape == (B,)
    assert det_boxes.shape == (B, MAX_PER_IMG, 4)
    assert det_scores.shape == (B, MAX_PER_IMG)
    assert det_classes.shape == (B, MAX_PER_IMG)
    print("KERNEL_OK")
</pallas_src>

<mosaic_0001>
module attributes {stable_mosaic.version = 11 : i64} {
  func.func @stage_kernel(%arg0: memref<16x256xbf16, #tpu.memory_space<vmem>>, %arg1: memref<16x4xf32, #tpu.memory_space<vmem>>, %arg2: memref<256x32xbf16, #tpu.memory_space<vmem>>, %arg3: memref<1x32xf32, #tpu.memory_space<vmem>>, %arg4: memref<32x32xbf16, #tpu.memory_space<vmem>>, %arg5: memref<1x32xf32, #tpu.memory_space<vmem>>, %arg6: memref<32x128xbf16, #tpu.memory_space<vmem>>, %arg7: memref<1x128xf32, #tpu.memory_space<vmem>>, %arg8: memref<16x128xf32, #tpu.memory_space<vmem>>) attributes {dimension_semantics = [], scalar_prefetch = 0 : i64, scratch_operands = 0 : i64, tpu.core_type = #tpu.core_type<tc>} {
    %c0 = arith.constant 0 : index
    %c0_0 = arith.constant 0 : index
    %0 = vector.load %arg0[%c0, %c0_0] : memref<16x256xbf16, #tpu.memory_space<vmem>>, vector<16x256xbf16>
    %c0_1 = arith.constant 0 : index
    %c0_2 = arith.constant 0 : index
    %1 = vector.load %arg2[%c0_1, %c0_2] : memref<256x32xbf16, #tpu.memory_space<vmem>>, vector<256x32xbf16>
    %cst = arith.constant dense<0.000000e+00> : vector<16x32xf32>
    %2 = tpu.matmul %0, %1, %cst {dimension_numbers = #tpu.dot_dimension_numbers<[1], [0], [0], [1], [0, 0, 1, 1], [], []>} : vector<16x256xbf16>, vector<256x32xbf16>, vector<16x32xf32> -> vector<16x32xf32>
    %c0_3 = arith.constant 0 : index
    %c0_4 = arith.constant 0 : index
    %3 = vector.load %arg3[%c0_3, %c0_4] : memref<1x32xf32, #tpu.memory_space<vmem>>, vector<1x32xf32>
    %4 = vector.broadcast %3 : vector<1x32xf32> to vector<16x32xf32>
    %5 = arith.addf %2, %4 : vector<16x32xf32>
    %cst_5 = arith.constant 0.000000e+00 : f32
    %6 = vector.broadcast %cst_5 : f32 to vector<16x32xf32>
    %7 = arith.maximumf %5, %6 : vector<16x32xf32>
    %8 = arith.truncf %7 : vector<16x32xf32> to vector<16x32xbf16>
    %c0_6 = arith.constant 0 : index
    %c0_7 = arith.constant 0 : index
    %9 = vector.load %arg4[%c0_6, %c0_7] : memref<32x32xbf16, #tpu.memory_space<vmem>>, vector<32x32xbf16>
    %cst_8 = arith.constant dense<0.000000e+00> : vector<16x32xf32>
    %10 = tpu.matmul %8, %9, %cst_8 {dimension_numbers = #tpu.dot_dimension_numbers<[1], [0], [0], [1], [0, 0, 1, 1], [], []>} : vector<16x32xbf16>, vector<32x32xbf16>, vector<16x32xf32> -> vector<16x32xf32>
    %c0_9 = arith.constant 0 : index
    %c0_10 = arith.constant 0 : index
    %11 = vector.load %arg5[%c0_9, %c0_10] : memref<1x32xf32, #tpu.memory_space<vmem>>, vector<1x32xf32>
    %12 = vector.broadcast %11 : vector<1x32xf32> to vector<16x32xf32>
    %13 = arith.addf %10, %12 : vector<16x32xf32>
    %cst_11 = arith.constant 0.000000e+00 : f32
    %14 = vector.broadcast %cst_11 : f32 to vector<16x32xf32>
    %15 = arith.maximumf %13, %14 : vector<16x32xf32>
    %16 = arith.truncf %15 : vector<16x32xf32> to vector<16x32xbf16>
    %c0_12 = arith.constant 0 : index
    %c0_13 = arith.constant 0 : index
    %17 = vector.load %arg6[%c0_12, %c0_13] : memref<32x128xbf16, #tpu.memory_space<vmem>>, vector<32x128xbf16>
    %cst_14 = arith.constant dense<0.000000e+00> : vector<16x128xf32>
    %18 = tpu.matmul %16, %17, %cst_14 {dimension_numbers = #tpu.dot_dimension_numbers<[1], [0], [0], [1], [0, 0, 1, 1], [], []>} : vector<16x32xbf16>, vector<32x128xbf16>, vector<16x128xf32> -> vector<16x128xf32>
    %c0_15 = arith.constant 0 : index
    %c0_16 = arith.constant 0 : index
    %19 = vector.load %arg7[%c0_15, %c0_16] : memref<1x128xf32, #tpu.memory_space<vmem>>, vector<1x128xf32>
    %20 = vector.broadcast %19 : vector<1x128xf32> to vector<16x128xf32>
    %21 = arith.addf %18, %20 : vector<16x128xf32>
    %22 = vector.extract_strided_slice %21 {offsets = [0, 0], sizes = [16, 5], strides = [1, 1]} : vector<16x128xf32> to vector<16x5xf32>
    %23 = vector.extract_strided_slice %21 {offsets = [0, 8], sizes = [16, 4], strides = [1, 1]} : vector<16x128xf32> to vector<16x4xf32>
    %cst_17 = arith.constant dense<0xFF800000> : vector<16xf32>
    %24 = vector.multi_reduction <maximumf>, %22, %cst_17 [1] : vector<16x5xf32> to vector<16xf32>
    %25 = vector.shape_cast %24 : vector<16xf32> to vector<16x1xf32>
    %26 = vector.broadcast %25 : vector<16x1xf32> to vector<16x5xf32>
    %27 = arith.subf %22, %26 : vector<16x5xf32>
    %28 = math.exp %27 : vector<16x5xf32>
    %cst_18 = arith.constant dense<0.000000e+00> : vector<16xf32>
    %29 = vector.multi_reduction <add>, %28, %cst_18 [1] : vector<16x5xf32> to vector<16xf32>
    %30 = vector.shape_cast %29 : vector<16xf32> to vector<16x1xf32>
    %31 = vector.broadcast %30 : vector<16x1xf32> to vector<16x5xf32>
    %32 = arith.divf %28, %31 : vector<16x5xf32>
    %c0_19 = arith.constant 0 : index
    %c0_20 = arith.constant 0 : index
    %33 = vector.load %arg1[%c0_19, %c0_20] : memref<16x4xf32, #tpu.memory_space<vmem>>, vector<16x4xf32>
    %34 = vector.extract_strided_slice %33 {offsets = [0, 0], sizes = [16, 1], strides = [1, 1]} : vector<16x4xf32> to vector<16x1xf32>
    %35 = vector.extract_strided_slice %33 {offsets = [0, 2], sizes = [16, 1], strides = [1, 1]} : vector<16x4xf32> to vector<16x1xf32>
    %36 = arith.addf %34, %35 : vector<16x1xf32>
    %cst_21 = arith.constant 5.000000e-01 : f32
    %37 = vector.broadcast %cst_21 : f32 to vector<16x1xf32>
    %38 = arith.mulf %36, %37 : vector<16x1xf32>
    %39 = vector.extract_strided_slice %33 {offsets = [0, 1], sizes = [16, 1], strides = [1, 1]} : vector<16x4xf32> to vector<16x1xf32>
    %40 = vector.extract_strided_slice %33 {offsets = [0, 3], sizes = [16, 1], strides = [1, 1]} : vector<16x4xf32> to vector<16x1xf32>
    %41 = arith.addf %39, %40 : vector<16x1xf32>
    %cst_22 = arith.constant 5.000000e-01 : f32
    %42 = vector.broadcast %cst_22 : f32 to vector<16x1xf32>
    %43 = arith.mulf %41, %42 : vector<16x1xf32>
    %44 = vector.extract_strided_slice %33 {offsets = [0, 2], sizes = [16, 1], strides = [1, 1]} : vector<16x4xf32> to vector<16x1xf32>
    %45 = vector.extract_strided_slice %33 {offsets = [0, 0], sizes = [16, 1], strides = [1, 1]} : vector<16x4xf32> to vector<16x1xf32>
    %46 = arith.subf %44, %45 : vector<16x1xf32>
    %47 = vector.extract_strided_slice %33 {offsets = [0, 3], sizes = [16, 1], strides = [1, 1]} : vector<16x4xf32> to vector<16x1xf32>
    %48 = vector.extract_strided_slice %33 {offsets = [0, 1], sizes = [16, 1], strides = [1, 1]} : vector<16x4xf32> to vector<16x1xf32>
    %49 = arith.subf %47, %48 : vector<16x1xf32>
    %50 = vector.extract_strided_slice %23 {offsets = [0, 0], sizes = [16, 1], strides = [1, 1]} : vector<16x4xf32> to vector<16x1xf32>
    %cst_23 = arith.constant 1.000000e-01 : f32
    %51 = vector.broadcast %cst_23 : f32 to vector<16x1xf32>
    %52 = arith.mulf %50, %51 : vector<16x1xf32>
    %cst_24 = arith.constant 0.000000e+00 : f32
    %53 = vector.broadcast %cst_24 : f32 to vector<16x1xf32>
    %54 = arith.addf %52, %53 : vector<16x1xf32>
    %55 = vector.extract_strided_slice %23 {offsets = [0, 1], sizes = [16, 1], strides = [1, 1]} : vector<16x4xf32> to vector<16x1xf32>
    %cst_25 = arith.constant 1.000000e-01 : f32
    %56 = vector.broadcast %cst_25 : f32 to vector<16x1xf32>
    %57 = arith.mulf %55, %56 : vector<16x1xf32>
    %cst_26 = arith.constant 0.000000e+00 : f32
    %58 = vector.broadcast %cst_26 : f32 to vector<16x1xf32>
    %59 = arith.addf %57, %58 : vector<16x1xf32>
    %60 = vector.extract_strided_slice %23 {offsets = [0, 2], sizes = [16, 1], strides = [1, 1]} : vector<16x4xf32> to vector<16x1xf32>
    %cst_27 = arith.constant 2.000000e-01 : f32
    %61 = vector.broadcast %cst_27 : f32 to vector<16x1xf32>
    %62 = arith.mulf %60, %61 : vector<16x1xf32>
    %cst_28 = arith.constant 0.000000e+00 : f32
    %63 = vector.broadcast %cst_28 : f32 to vector<16x1xf32>
    %64 = arith.addf %62, %63 : vector<16x1xf32>
    %65 = vector.extract_strided_slice %23 {offsets = [0, 3], sizes = [16, 1], strides = [1, 1]} : vector<16x4xf32> to vector<16x1xf32>
    %cst_29 = arith.constant 2.000000e-01 : f32
    %66 = vector.broadcast %cst_29 : f32 to vector<16x1xf32>
    %67 = arith.mulf %65, %66 : vector<16x1xf32>
    %cst_30 = arith.constant 0.000000e+00 : f32
    %68 = vector.broadcast %cst_30 : f32 to vector<16x1xf32>
    %69 = arith.addf %67, %68 : vector<16x1xf32>
    %cst_31 = arith.constant -4.13516665 : f32
    %cst_32 = arith.constant 4.13516665 : f32
    %70 = vector.broadcast %cst_31 : f32 to vector<16x1xf32>
    %71 = arith.maximumf %70, %64 : vector<16x1xf32>
    %72 = vector.broadcast %cst_32 : f32 to vector<16x1xf32>
    %73 = arith.minimumf %72, %71 : vector<16x1xf32>
    %cst_33 = arith.constant -4.13516665 : f32
    %cst_34 = arith.constant 4.13516665 : f32
    %74 = vector.broadcast %cst_33 : f32 to vector<16x1xf32>
    %75 = arith.maximumf %74, %69 : vector<16x1xf32>
    %76 = vector.broadcast %cst_34 : f32 to vector<16x1xf32>
    %77 = arith.minimumf %76, %75 : vector<16x1xf32>
    %78 = math.exp %73 : vector<16x1xf32>
    %79 = arith.mulf %46, %78 : vector<16x1xf32>
    %80 = math.exp %77 : vector<16x1xf32>
    %81 = arith.mulf %49, %80 : vector<16x1xf32>
    %82 = arith.mulf %46, %54 : vector<16x1xf32>
    %83 = arith.addf %38, %82 : vector<16x1xf32>
    %84 = arith.mulf %49, %59 : vector<16x1xf32>
    %85 = arith.addf %43, %84 : vector<16x1xf32>
    %cst_35 = arith.constant 5.000000e-01 : f32
    %86 = vector.broadcast %cst_35 : f32 to vector<16x1xf32>
    %87 = arith.mulf %79, %86 : vector<16x1xf32>
    %88 = arith.subf %83, %87 : vector<16x1xf32>
    %cst_36 = arith.constant 0.000000e+00 : f32
    %cst_37 = arith.constant 6.400000e+01 : f32
    %89 = vector.broadcast %cst_36 : f32 to vector<16x1xf32>
    %90 = arith.maximumf %89, %88 : vector<16x1xf32>
    %91 = vector.broadcast %cst_37 : f32 to vector<16x1xf32>
    %92 = arith.minimumf %91, %90 : vector<16x1xf32>
    %cst_38 = arith.constant 5.000000e-01 : f32
    %93 = vector.broadcast %cst_38 : f32 to vector<16x1xf32>
    %94 = arith.mulf %81, %93 : vector<16x1xf32>
    %95 = arith.subf %85, %94 : vector<16x1xf32>
    %cst_39 = arith.constant 0.000000e+00 : f32
    %cst_40 = arith.constant 6.400000e+01 : f32
    %96 = vector.broadcast %cst_39 : f32 to vector<16x1xf32>
    %97 = arith.maximumf %96, %95 : vector<16x1xf32>
    %98 = vector.broadcast %cst_40 : f32 to vector<16x1xf32>
    %99 = arith.minimumf %98, %97 : vector<16x1xf32>
    %cst_41 = arith.constant 5.000000e-01 : f32
    %100 = vector.broadcast %cst_41 : f32 to vector<16x1xf32>
    %101 = arith.mulf %79, %100 : vector<16x1xf32>
    %102 = arith.addf %83, %101 : vector<16x1xf32>
    %cst_42 = arith.constant 0.000000e+00 : f32
    %cst_43 = arith.constant 6.400000e+01 : f32
    %103 = vector.broadcast %cst_42 : f32 to vector<16x1xf32>
    %104 = arith.maximumf %103, %102 : vector<16x1xf32>
    %105 = vector.broadcast %cst_43 : f32 to vector<16x1xf32>
    %106 = arith.minimumf %105, %104 : vector<16x1xf32>
    %cst_44 = arith.constant 5.000000e-01 : f32
    %107 = vector.broadcast %cst_44 : f32 to vector<16x1xf32>
    %108 = arith.mulf %81, %107 : vector<16x1xf32>
    %109 = arith.addf %85, %108 : vector<16x1xf32>
    %cst_45 = arith.constant 0.000000e+00 : f32
    %cst_46 = arith.constant 6.400000e+01 : f32
    %110 = vector.broadcast %cst_45 : f32 to vector<16x1xf32>
    %111 = arith.maximumf %110, %109 : vector<16x1xf32>
    %112 = vector.broadcast %cst_46 : f32 to vector<16x1xf32>
    %113 = arith.minimumf %112, %111 : vector<16x1xf32>
    %c0_47 = arith.constant 0 : index
    %c0_48 = arith.constant 0 : index
    %114 = vector.load %arg8[%c0_47, %c0_48] : memref<16x128xf32, #tpu.memory_space<vmem>>, vector<16x128xf32>
    tpu.vector_store %arg8[%c0_47, %c0_48], %21 {strides = array<i32>} : memref<16x128xf32, #tpu.memory_space<vmem>>, vector<16x128xf32>,
    %c0_49 = arith.constant 0 : index
    %c16 = arith.constant 16 : index
    %115 = vector.load %arg8[%c0_49, %c16] : memref<16x128xf32, #tpu.memory_space<vmem>>, vector<16x5xf32>
    tpu.vector_store %arg8[%c0_49, %c16], %32 {strides = array<i32>} : memref<16x128xf32, #tpu.memory_space<vmem>>, vector<16x5xf32>,
    %c0_50 = arith.constant 0 : index
    %c24 = arith.constant 24 : index
    %116 = vector.load %arg8[%c0_50, %c24] : memref<16x128xf32, #tpu.memory_space<vmem>>, vector<16x1xf32>
    tpu.vector_store %arg8[%c0_50, %c24], %92 {strides = array<i32>} : memref<16x128xf32, #tpu.memory_space<vmem>>, vector<16x1xf32>,
    %c0_51 = arith.constant 0 : index
    %c25 = arith.constant 25 : index
    %117 = vector.load %arg8[%c0_51, %c25] : memref<16x128xf32, #tpu.memory_space<vmem>>, vector<16x1xf32>
    tpu.vector_store %arg8[%c0_51, %c25], %99 {strides = array<i32>} : memref<16x128xf32, #tpu.memory_space<vmem>>, vector<16x1xf32>,
    %c0_52 = arith.constant 0 : index
    %c26 = arith.constant 26 : index
    %118 = vector.load %arg8[%c0_52, %c26] : memref<16x128xf32, #tpu.memory_space<vmem>>, vector<16x1xf32>
    tpu.vector_store %arg8[%c0_52, %c26], %106 {strides = array<i32>} : memref<16x128xf32, #tpu.memory_space<vmem>>, vector<16x1xf32>,
    %c0_53 = arith.constant 0 : index
    %c27 = arith.constant 27 : index
    %119 = vector.load %arg8[%c0_53, %c27] : memref<16x128xf32, #tpu.memory_space<vmem>>, vector<16x1xf32>
    tpu.vector_store %arg8[%c0_53, %c27], %113 {strides = array<i32>} : memref<16x128xf32, #tpu.memory_space<vmem>>, vector<16x1xf32>,
    return
  }
}

module attributes {stable_mosaic.version = 11 : i64} {
  func.func @stage_kernel(%arg0: memref<16x256xbf16, #tpu.memory_space<vmem>>, %arg1: memref<16x4xf32, #tpu.memory_space<vmem>>, %arg2: memref<256x32xbf16, #tpu.memory_space<vmem>>, %arg3: memref<1x32xf32, #tpu.memory_space<vmem>>, %arg4: memref<32x32xbf16, #tpu.memory_space<vmem>>, %arg5: memref<1x32xf32, #tpu.memory_space<vmem>>, %arg6: memref<32x128xbf16, #tpu.memory_space<vmem>>, %arg7: memref<1x128xf32, #tpu.memory_space<vmem>>, %arg8: memref<16x128xf32, #tpu.memory_space<vmem>>) attributes {dimension_semantics = [], scalar_prefetch = 0 : i64, scratch_operands = 0 : i64, tpu.core_type = #tpu.core_type<tc>} {
    %c0 = arith.constant 0 : index
    %c0_0 = arith.constant 0 : index
    %0 = vector.load %arg0[%c0, %c0_0] : memref<16x256xbf16, #tpu.memory_space<vmem>>, vector<16x256xbf16>
    %c0_1 = arith.constant 0 : index
    %c0_2 = arith.constant 0 : index
    %1 = vector.load %arg2[%c0_1, %c0_2] : memref<256x32xbf16, #tpu.memory_space<vmem>>, vector<256x32xbf16>
    %cst = arith.constant dense<0.000000e+00> : vector<16x32xf32>
    %2 = tpu.matmul %0, %1, %cst {dimension_numbers = #tpu.dot_dimension_numbers<[1], [0], [0], [1], [0, 0, 1, 1], [], []>} : vector<16x256xbf16>, vector<256x32xbf16>, vector<16x32xf32> -> vector<16x32xf32>
    %c0_3 = arith.constant 0 : index
    %c0_4 = arith.constant 0 : index
    %3 = vector.load %arg3[%c0_3, %c0_4] : memref<1x32xf32, #tpu.memory_space<vmem>>, vector<1x32xf32>
    %4 = vector.broadcast %3 : vector<1x32xf32> to vector<16x32xf32>
    %5 = arith.addf %2, %4 : vector<16x32xf32>
    %cst_5 = arith.constant 0.000000e+00 : f32
    %6 = vector.broadcast %cst_5 : f32 to vector<16x32xf32>
    %7 = arith.maximumf %5, %6 : vector<16x32xf32>
    %8 = arith.truncf %7 : vector<16x32xf32> to vector<16x32xbf16>
    %c0_6 = arith.constant 0 : index
    %c0_7 = arith.constant 0 : index
    %9 = vector.load %arg4[%c0_6, %c0_7] : memref<32x32xbf16, #tpu.memory_space<vmem>>, vector<32x32xbf16>
    %cst_8 = arith.constant dense<0.000000e+00> : vector<16x32xf32>
    %10 = tpu.matmul %8, %9, %cst_8 {dimension_numbers = #tpu.dot_dimension_numbers<[1], [0], [0], [1], [0, 0, 1, 1], [], []>} : vector<16x32xbf16>, vector<32x32xbf16>, vector<16x32xf32> -> vector<16x32xf32>
    %c0_9 = arith.constant 0 : index
    %c0_10 = arith.constant 0 : index
    %11 = vector.load %arg5[%c0_9, %c0_10] : memref<1x32xf32, #tpu.memory_space<vmem>>, vector<1x32xf32>
    %12 = vector.broadcast %11 : vector<1x32xf32> to vector<16x32xf32>
    %13 = arith.addf %10, %12 : vector<16x32xf32>
    %cst_11 = arith.constant 0.000000e+00 : f32
    %14 = vector.broadcast %cst_11 : f32 to vector<16x32xf32>
    %15 = arith.maximumf %13, %14 : vector<16x32xf32>
    %16 = arith.truncf %15 : vector<16x32xf32> to vector<16x32xbf16>
    %c0_12 = arith.constant 0 : index
    %c0_13 = arith.constant 0 : index
    %17 = vector.load %arg6[%c0_12, %c0_13] : memref<32x128xbf16, #tpu.memory_space<vmem>>, vector<32x128xbf16>
    %cst_14 = arith.constant dense<0.000000e+00> : vector<16x128xf32>
    %18 = tpu.matmul %16, %17, %cst_14 {dimension_numbers = #tpu.dot_dimension_numbers<[1], [0], [0], [1], [0, 0, 1, 1], [], []>} : vector<16x32xbf16>, vector<32x128xbf16>, vector<16x128xf32> -> vector<16x128xf32>
    %c0_15 = arith.constant 0 : index
    %c0_16 = arith.constant 0 : index
    %19 = vector.load %arg7[%c0_15, %c0_16] : memref<1x128xf32, #tpu.memory_space<vmem>>, vector<1x128xf32>
    %20 = vector.broadcast %19 : vector<1x128xf32> to vector<16x128xf32>
    %21 = arith.addf %18, %20 : vector<16x128xf32>
    %22 = vector.extract_strided_slice %21 {offsets = [0, 0], sizes = [16, 5], strides = [1, 1]} : vector<16x128xf32> to vector<16x5xf32>
    %23 = vector.extract_strided_slice %21 {offsets = [0, 8], sizes = [16, 4], strides = [1, 1]} : vector<16x128xf32> to vector<16x4xf32>
    %cst_17 = arith.constant dense<0xFF800000> : vector<16xf32>
    %24 = vector.multi_reduction <maximumf>, %22, %cst_17 [1] : vector<16x5xf32> to vector<16xf32>
    %25 = vector.shape_cast %24 : vector<16xf32> to vector<16x1xf32>
    %26 = vector.broadcast %25 : vector<16x1xf32> to vector<16x5xf32>
    %27 = arith.subf %22, %26 : vector<16x5xf32>
    %28 = math.exp %27 : vector<16x5xf32>
    %cst_18 = arith.constant dense<0.000000e+00> : vector<16xf32>
    %29 = vector.multi_reduction <add>, %28, %cst_18 [1] : vector<16x5xf32> to vector<16xf32>
    %30 = vector.shape_cast %29 : vector<16xf32> to vector<16x1xf32>
    %31 = vector.broadcast %30 : vector<16x1xf32> to vector<16x5xf32>
    %32 = arith.divf %28, %31 : vector<16x5xf32>
    %c0_19 = arith.constant 0 : index
    %c0_20 = arith.constant 0 : index
    %33 = vector.load %arg1[%c0_19, %c0_20] : memref<16x4xf32, #tpu.memory_space<vmem>>, vector<16x4xf32>
    %34 = vector.extract_strided_slice %33 {offsets = [0, 0], sizes = [16, 1], strides = [1, 1]} : vector<16x4xf32> to vector<16x1xf32>
    %35 = vector.extract_strided_slice %33 {offsets = [0, 2], sizes = [16, 1], strides = [1, 1]} : vector<16x4xf32> to vector<16x1xf32>
    %36 = arith.addf %34, %35 : vector<16x1xf32>
    %cst_21 = arith.constant 5.000000e-01 : f32
    %37 = vector.broadcast %cst_21 : f32 to vector<16x1xf32>
    %38 = arith.mulf %36, %37 : vector<16x1xf32>
    %39 = vector.extract_strided_slice %33 {offsets = [0, 1], sizes = [16, 1], strides = [1, 1]} : vector<16x4xf32> to vector<16x1xf32>
    %40 = vector.extract_strided_slice %33 {offsets = [0, 3], sizes = [16, 1], strides = [1, 1]} : vector<16x4xf32> to vector<16x1xf32>
    %41 = arith.addf %39, %40 : vector<16x1xf32>
    %cst_22 = arith.constant 5.000000e-01 : f32
    %42 = vector.broadcast %cst_22 : f32 to vector<16x1xf32>
    %43 = arith.mulf %41, %42 : vector<16x1xf32>
    %44 = vector.extract_strided_slice %33 {offsets = [0, 2], sizes = [16, 1], strides = [1, 1]} : vector<16x4xf32> to vector<16x1xf32>
    %45 = vector.extract_strided_slice %33 {offsets = [0, 0], sizes = [16, 1], strides = [1, 1]} : vector<16x4xf32> to vector<16x1xf32>
    %46 = arith.subf %44, %45 : vector<16x1xf32>
    %47 = vector.extract_strided_slice %33 {offsets = [0, 3], sizes = [16, 1], strides = [1, 1]} : vector<16x4xf32> to vector<16x1xf32>
    %48 = vector.extract_strided_slice %33 {offsets = [0, 1], sizes = [16, 1], strides = [1, 1]} : vector<16x4xf32> to vector<16x1xf32>
    %49 = arith.subf %47, %48 : vector<16x1xf32>
    %50 = vector.extract_strided_slice %23 {offsets = [0, 0], sizes = [16, 1], strides = [1, 1]} : vector<16x4xf32> to vector<16x1xf32>
    %cst_23 = arith.constant 5.000000e-02 : f32
    %51 = vector.broadcast %cst_23 : f32 to vector<16x1xf32>
    %52 = arith.mulf %50, %51 : vector<16x1xf32>
    %cst_24 = arith.constant 0.000000e+00 : f32
    %53 = vector.broadcast %cst_24 : f32 to vector<16x1xf32>
    %54 = arith.addf %52, %53 : vector<16x1xf32>
    %55 = vector.extract_strided_slice %23 {offsets = [0, 1], sizes = [16, 1], strides = [1, 1]} : vector<16x4xf32> to vector<16x1xf32>
    %cst_25 = arith.constant 5.000000e-02 : f32
    %56 = vector.broadcast %cst_25 : f32 to vector<16x1xf32>
    %57 = arith.mulf %55, %56 : vector<16x1xf32>
    %cst_26 = arith.constant 0.000000e+00 : f32
    %58 = vector.broadcast %cst_26 : f32 to vector<16x1xf32>
    %59 = arith.addf %57, %58 : vector<16x1xf32>
    %60 = vector.extract_strided_slice %23 {offsets = [0, 2], sizes = [16, 1], strides = [1, 1]} : vector<16x4xf32> to vector<16x1xf32>
    %cst_27 = arith.constant 1.000000e-01 : f32
    %61 = vector.broadcast %cst_27 : f32 to vector<16x1xf32>
    %62 = arith.mulf %60, %61 : vector<16x1xf32>
    %cst_28 = arith.constant 0.000000e+00 : f32
    %63 = vector.broadcast %cst_28 : f32 to vector<16x1xf32>
    %64 = arith.addf %62, %63 : vector<16x1xf32>
    %65 = vector.extract_strided_slice %23 {offsets = [0, 3], sizes = [16, 1], strides = [1, 1]} : vector<16x4xf32> to vector<16x1xf32>
    %cst_29 = arith.constant 1.000000e-01 : f32
    %66 = vector.broadcast %cst_29 : f32 to vector<16x1xf32>
    %67 = arith.mulf %65, %66 : vector<16x1xf32>
    %cst_30 = arith.constant 0.000000e+00 : f32
    %68 = vector.broadcast %cst_30 : f32 to vector<16x1xf32>
    %69 = arith.addf %67, %68 : vector<16x1xf32>
    %cst_31 = arith.constant -4.13516665 : f32
    %cst_32 = arith.constant 4.13516665 : f32
    %70 = vector.broadcast %cst_31 : f32 to vector<16x1xf32>
    %71 = arith.maximumf %70, %64 : vector<16x1xf32>
    %72 = vector.broadcast %cst_32 : f32 to vector<16x1xf32>
    %73 = arith.minimumf %72, %71 : vector<16x1xf32>
    %cst_33 = arith.constant -4.13516665 : f32
    %cst_34 = arith.constant 4.13516665 : f32
    %74 = vector.broadcast %cst_33 : f32 to vector<16x1xf32>
    %75 = arith.maximumf %74, %69 : vector<16x1xf32>
    %76 = vector.broadcast %cst_34 : f32 to vector<16x1xf32>
    %77 = arith.minimumf %76, %75 : vector<16x1xf32>
    %78 = math.exp %73 : vector<16x1xf32>
    %79 = arith.mulf %46, %78 : vector<16x1xf32>
    %80 = math.exp %77 : vector<16x1xf32>
    %81 = arith.mulf %49, %80 : vector<16x1xf32>
    %82 = arith.mulf %46, %54 : vector<16x1xf32>
    %83 = arith.addf %38, %82 : vector<16x1xf32>
    %84 = arith.mulf %49, %59 : vector<16x1xf32>
    %85 = arith.addf %43, %84 : vector<16x1xf32>
    %cst_35 = arith.constant 5.000000e-01 : f32
    %86 = vector.broadcast %cst_35 : f32 to vector<16x1xf32>
    %87 = arith.mulf %79, %86 : vector<16x1xf32>
    %88 = arith.subf %83, %87 : vector<16x1xf32>
    %cst_36 = arith.constant 0.000000e+00 : f32
    %cst_37 = arith.constant 6.400000e+01 : f32
    %89 = vector.broadcast %cst_36 : f32 to vector<16x1xf32>
    %90 = arith.maximumf %89, %88 : vector<16x1xf32>
    %91 = vector.broadcast %cst_37 : f32 to vector<16x1xf32>
    %92 = arith.minimumf %91, %90 : vector<16x1xf32>
    %cst_38 = arith.constant 5.000000e-01 : f32
    %93 = vector.broadcast %cst_38 : f32 to vector<16x1xf32>
    %94 = arith.mulf %81, %93 : vector<16x1xf32>
    %95 = arith.subf %85, %94 : vector<16x1xf32>
    %cst_39 = arith.constant 0.000000e+00 : f32
    %cst_40 = arith.constant 6.400000e+01 : f32
    %96 = vector.broadcast %cst_39 : f32 to vector<16x1xf32>
    %97 = arith.maximumf %96, %95 : vector<16x1xf32>
    %98 = vector.broadcast %cst_40 : f32 to vector<16x1xf32>
    %99 = arith.minimumf %98, %97 : vector<16x1xf32>
    %cst_41 = arith.constant 5.000000e-01 : f32
    %100 = vector.broadcast %cst_41 : f32 to vector<16x1xf32>
    %101 = arith.mulf %79, %100 : vector<16x1xf32>
    %102 = arith.addf %83, %101 : vector<16x1xf32>
    %cst_42 = arith.constant 0.000000e+00 : f32
    %cst_43 = arith.constant 6.400000e+01 : f32
    %103 = vector.broadcast %cst_42 : f32 to vector<16x1xf32>
    %104 = arith.maximumf %103, %102 : vector<16x1xf32>
    %105 = vector.broadcast %cst_43 : f32 to vector<16x1xf32>
    %106 = arith.minimumf %105, %104 : vector<16x1xf32>
    %cst_44 = arith.constant 5.000000e-01 : f32
    %107 = vector.broadcast %cst_44 : f32 to vector<16x1xf32>
    %108 = arith.mulf %81, %107 : vector<16x1xf32>
    %109 = arith.addf %85, %108 : vector<16x1xf32>
    %cst_45 = arith.constant 0.000000e+00 : f32
    %cst_46 = arith.constant 6.400000e+01 : f32
    %110 = vector.broadcast %cst_45 : f32 to vector<16x1xf32>
    %111 = arith.maximumf %110, %109 : vector<16x1xf32>
    %112 = vector.broadcast %cst_46 : f32 to vector<16x1xf32>
    %113 = arith.minimumf %112, %111 : vector<16x1xf32>
    %c0_47 = arith.constant 0 : index
    %c0_48 = arith.constant 0 : index
    %114 = vector.load %arg8[%c0_47, %c0_48] : memref<16x128xf32, #tpu.memory_space<vmem>>, vector<16x128xf32>
    tpu.vector_store %arg8[%c0_47, %c0_48], %21 {strides = array<i32>} : memref<16x128xf32, #tpu.memory_space<vmem>>, vector<16x128xf32>,
    %c0_49 = arith.constant 0 : index
    %c16 = arith.constant 16 : index
    %115 = vector.load %arg8[%c0_49, %c16] : memref<16x128xf32, #tpu.memory_space<vmem>>, vector<16x5xf32>
    tpu.vector_store %arg8[%c0_49, %c16], %32 {strides = array<i32>} : memref<16x128xf32, #tpu.memory_space<vmem>>, vector<16x5xf32>,
    %c0_50 = arith.constant 0 : index
    %c24 = arith.constant 24 : index
    %116 = vector.load %arg8[%c0_50, %c24] : memref<16x128xf32, #tpu.memory_space<vmem>>, vector<16x1xf32>
    tpu.vector_store %arg8[%c0_50, %c24], %92 {strides = array<i32>} : memref<16x128xf32, #tpu.memory_space<vmem>>, vector<16x1xf32>,
    %c0_51 = arith.constant 0 : index
    %c25 = arith.constant 25 : index
    %117 = vector.load %arg8[%c0_51, %c25] : memref<16x128xf32, #tpu.memory_space<vmem>>, vector<16x1xf32>
    tpu.vector_store %arg8[%c0_51, %c25], %99 {strides = array<i32>} : memref<16x128xf32, #tpu.memory_space<vmem>>, vector<16x1xf32>,
    %c0_52 = arith.constant 0 : index
    %c26 = arith.constant 26 : index
    %118 = vector.load %arg8[%c0_52, %c26] : memref<16x128xf32, #tpu.memory_space<vmem>>, vector<16x1xf32>
    tpu.vector_store %arg8[%c0_52, %c26], %106 {strides = array<i32>} : memref<16x128xf32, #tpu.memory_space<vmem>>, vector<16x1xf32>,
    %c0_53 = arith.constant 0 : index
    %c27 = arith.constant 27 : index
    %119 = vector.load %arg8[%c0_53, %c27] : memref<16x128xf32, #tpu.memory_space<vmem>>, vector<16x1xf32>
    tpu.vector_store %arg8[%c0_53, %c27], %113 {strides = array<i32>} : memref<16x128xf32, #tpu.memory_space<vmem>>, vector<16x1xf32>,
    return
  }
}

module attributes {stable_mosaic.version = 11 : i64} {
  func.func @stage_kernel(%arg0: memref<16x256xbf16, #tpu.memory_space<vmem>>, %arg1: memref<16x4xf32, #tpu.memory_space<vmem>>, %arg2: memref<256x32xbf16, #tpu.memory_space<vmem>>, %arg3: memref<1x32xf32, #tpu.memory_space<vmem>>, %arg4: memref<32x32xbf16, #tpu.memory_space<vmem>>, %arg5: memref<1x32xf32, #tpu.memory_space<vmem>>, %arg6: memref<32x128xbf16, #tpu.memory_space<vmem>>, %arg7: memref<1x128xf32, #tpu.memory_space<vmem>>, %arg8: memref<16x128xf32, #tpu.memory_space<vmem>>) attributes {dimension_semantics = [], scalar_prefetch = 0 : i64, scratch_operands = 0 : i64, tpu.core_type = #tpu.core_type<tc>} {
    %c0 = arith.constant 0 : index
    %c0_0 = arith.constant 0 : index
    %0 = vector.load %arg0[%c0, %c0_0] : memref<16x256xbf16, #tpu.memory_space<vmem>>, vector<16x256xbf16>
    %c0_1 = arith.constant 0 : index
    %c0_2 = arith.constant 0 : index
    %1 = vector.load %arg2[%c0_1, %c0_2] : memref<256x32xbf16, #tpu.memory_space<vmem>>, vector<256x32xbf16>
    %cst = arith.constant dense<0.000000e+00> : vector<16x32xf32>
    %2 = tpu.matmul %0, %1, %cst {dimension_numbers = #tpu.dot_dimension_numbers<[1], [0], [0], [1], [0, 0, 1, 1], [], []>} : vector<16x256xbf16>, vector<256x32xbf16>, vector<16x32xf32> -> vector<16x32xf32>
    %c0_3 = arith.constant 0 : index
    %c0_4 = arith.constant 0 : index
    %3 = vector.load %arg3[%c0_3, %c0_4] : memref<1x32xf32, #tpu.memory_space<vmem>>, vector<1x32xf32>
    %4 = vector.broadcast %3 : vector<1x32xf32> to vector<16x32xf32>
    %5 = arith.addf %2, %4 : vector<16x32xf32>
    %cst_5 = arith.constant 0.000000e+00 : f32
    %6 = vector.broadcast %cst_5 : f32 to vector<16x32xf32>
    %7 = arith.maximumf %5, %6 : vector<16x32xf32>
    %8 = arith.truncf %7 : vector<16x32xf32> to vector<16x32xbf16>
    %c0_6 = arith.constant 0 : index
    %c0_7 = arith.constant 0 : index
    %9 = vector.load %arg4[%c0_6, %c0_7] : memref<32x32xbf16, #tpu.memory_space<vmem>>, vector<32x32xbf16>
    %cst_8 = arith.constant dense<0.000000e+00> : vector<16x32xf32>
    %10 = tpu.matmul %8, %9, %cst_8 {dimension_numbers = #tpu.dot_dimension_numbers<[1], [0], [0], [1], [0, 0, 1, 1], [], []>} : vector<16x32xbf16>, vector<32x32xbf16>, vector<16x32xf32> -> vector<16x32xf32>
    %c0_9 = arith.constant 0 : index
    %c0_10 = arith.constant 0 : index
    %11 = vector.load %arg5[%c0_9, %c0_10] : memref<1x32xf32, #tpu.memory_space<vmem>>, vector<1x32xf32>
    %12 = vector.broadcast %11 : vector<1x32xf32> to vector<16x32xf32>
    %13 = arith.addf %10, %12 : vector<16x32xf32>
    %cst_11 = arith.constant 0.000000e+00 : f32
    %14 = vector.broadcast %cst_11 : f32 to vector<16x32xf32>
    %15 = arith.maximumf %13, %14 : vector<16x32xf32>
    %16 = arith.truncf %15 : vector<16x32xf32> to vector<16x32xbf16>
    %c0_12 = arith.constant 0 : index
    %c0_13 = arith.constant 0 : index
    %17 = vector.load %arg6[%c0_12, %c0_13] : memref<32x128xbf16, #tpu.memory_space<vmem>>, vector<32x128xbf16>
    %cst_14 = arith.constant dense<0.000000e+00> : vector<16x128xf32>
    %18 = tpu.matmul %16, %17, %cst_14 {dimension_numbers = #tpu.dot_dimension_numbers<[1], [0], [0], [1], [0, 0, 1, 1], [], []>} : vector<16x32xbf16>, vector<32x128xbf16>, vector<16x128xf32> -> vector<16x128xf32>
    %c0_15 = arith.constant 0 : index
    %c0_16 = arith.constant 0 : index
    %19 = vector.load %arg7[%c0_15, %c0_16] : memref<1x128xf32, #tpu.memory_space<vmem>>, vector<1x128xf32>
    %20 = vector.broadcast %19 : vector<1x128xf32> to vector<16x128xf32>
    %21 = arith.addf %18, %20 : vector<16x128xf32>
    %22 = vector.extract_strided_slice %21 {offsets = [0, 0], sizes = [16, 5], strides = [1, 1]} : vector<16x128xf32> to vector<16x5xf32>
    %23 = vector.extract_strided_slice %21 {offsets = [0, 8], sizes = [16, 4], strides = [1, 1]} : vector<16x128xf32> to vector<16x4xf32>
    %cst_17 = arith.constant dense<0xFF800000> : vector<16xf32>
    %24 = vector.multi_reduction <maximumf>, %22, %cst_17 [1] : vector<16x5xf32> to vector<16xf32>
    %25 = vector.shape_cast %24 : vector<16xf32> to vector<16x1xf32>
    %26 = vector.broadcast %25 : vector<16x1xf32> to vector<16x5xf32>
    %27 = arith.subf %22, %26 : vector<16x5xf32>
    %28 = math.exp %27 : vector<16x5xf32>
    %cst_18 = arith.constant dense<0.000000e+00> : vector<16xf32>
    %29 = vector.multi_reduction <add>, %28, %cst_18 [1] : vector<16x5xf32> to vector<16xf32>
    %30 = vector.shape_cast %29 : vector<16xf32> to vector<16x1xf32>
    %31 = vector.broadcast %30 : vector<16x1xf32> to vector<16x5xf32>
    %32 = arith.divf %28, %31 : vector<16x5xf32>
    %c0_19 = arith.constant 0 : index
    %c0_20 = arith.constant 0 : index
    %33 = vector.load %arg1[%c0_19, %c0_20] : memref<16x4xf32, #tpu.memory_space<vmem>>, vector<16x4xf32>
    %34 = vector.extract_strided_slice %33 {offsets = [0, 0], sizes = [16, 1], strides = [1, 1]} : vector<16x4xf32> to vector<16x1xf32>
    %35 = vector.extract_strided_slice %33 {offsets = [0, 2], sizes = [16, 1], strides = [1, 1]} : vector<16x4xf32> to vector<16x1xf32>
    %36 = arith.addf %34, %35 : vector<16x1xf32>
    %cst_21 = arith.constant 5.000000e-01 : f32
    %37 = vector.broadcast %cst_21 : f32 to vector<16x1xf32>
    %38 = arith.mulf %36, %37 : vector<16x1xf32>
    %39 = vector.extract_strided_slice %33 {offsets = [0, 1], sizes = [16, 1], strides = [1, 1]} : vector<16x4xf32> to vector<16x1xf32>
    %40 = vector.extract_strided_slice %33 {offsets = [0, 3], sizes = [16, 1], strides = [1, 1]} : vector<16x4xf32> to vector<16x1xf32>
    %41 = arith.addf %39, %40 : vector<16x1xf32>
    %cst_22 = arith.constant 5.000000e-01 : f32
    %42 = vector.broadcast %cst_22 : f32 to vector<16x1xf32>
    %43 = arith.mulf %41, %42 : vector<16x1xf32>
    %44 = vector.extract_strided_slice %33 {offsets = [0, 2], sizes = [16, 1], strides = [1, 1]} : vector<16x4xf32> to vector<16x1xf32>
    %45 = vector.extract_strided_slice %33 {offsets = [0, 0], sizes = [16, 1], strides = [1, 1]} : vector<16x4xf32> to vector<16x1xf32>
    %46 = arith.subf %44, %45 : vector<16x1xf32>
    %47 = vector.extract_strided_slice %33 {offsets = [0, 3], sizes = [16, 1], strides = [1, 1]} : vector<16x4xf32> to vector<16x1xf32>
    %48 = vector.extract_strided_slice %33 {offsets = [0, 1], sizes = [16, 1], strides = [1, 1]} : vector<16x4xf32> to vector<16x1xf32>
    %49 = arith.subf %47, %48 : vector<16x1xf32>
    %50 = vector.extract_strided_slice %23 {offsets = [0, 0], sizes = [16, 1], strides = [1, 1]} : vector<16x4xf32> to vector<16x1xf32>
    %cst_23 = arith.constant 3.300000e-02 : f32
    %51 = vector.broadcast %cst_23 : f32 to vector<16x1xf32>
    %52 = arith.mulf %50, %51 : vector<16x1xf32>
    %cst_24 = arith.constant 0.000000e+00 : f32
    %53 = vector.broadcast %cst_24 : f32 to vector<16x1xf32>
    %54 = arith.addf %52, %53 : vector<16x1xf32>
    %55 = vector.extract_strided_slice %23 {offsets = [0, 1], sizes = [16, 1], strides = [1, 1]} : vector<16x4xf32> to vector<16x1xf32>
    %cst_25 = arith.constant 3.300000e-02 : f32
    %56 = vector.broadcast %cst_25 : f32 to vector<16x1xf32>
    %57 = arith.mulf %55, %56 : vector<16x1xf32>
    %cst_26 = arith.constant 0.000000e+00 : f32
    %58 = vector.broadcast %cst_26 : f32 to vector<16x1xf32>
    %59 = arith.addf %57, %58 : vector<16x1xf32>
    %60 = vector.extract_strided_slice %23 {offsets = [0, 2], sizes = [16, 1], strides = [1, 1]} : vector<16x4xf32> to vector<16x1xf32>
    %cst_27 = arith.constant 6.700000e-02 : f32
    %61 = vector.broadcast %cst_27 : f32 to vector<16x1xf32>
    %62 = arith.mulf %60, %61 : vector<16x1xf32>
    %cst_28 = arith.constant 0.000000e+00 : f32
    %63 = vector.broadcast %cst_28 : f32 to vector<16x1xf32>
    %64 = arith.addf %62, %63 : vector<16x1xf32>
    %65 = vector.extract_strided_slice %23 {offsets = [0, 3], sizes = [16, 1], strides = [1, 1]} : vector<16x4xf32> to vector<16x1xf32>
    %cst_29 = arith.constant 6.700000e-02 : f32
    %66 = vector.broadcast %cst_29 : f32 to vector<16x1xf32>
    %67 = arith.mulf %65, %66 : vector<16x1xf32>
    %cst_30 = arith.constant 0.000000e+00 : f32
    %68 = vector.broadcast %cst_30 : f32 to vector<16x1xf32>
    %69 = arith.addf %67, %68 : vector<16x1xf32>
    %cst_31 = arith.constant -4.13516665 : f32
    %cst_32 = arith.constant 4.13516665 : f32
    %70 = vector.broadcast %cst_31 : f32 to vector<16x1xf32>
    %71 = arith.maximumf %70, %64 : vector<16x1xf32>
    %72 = vector.broadcast %cst_32 : f32 to vector<16x1xf32>
    %73 = arith.minimumf %72, %71 : vector<16x1xf32>
    %cst_33 = arith.constant -4.13516665 : f32
    %cst_34 = arith.constant 4.13516665 : f32
    %74 = vector.broadcast %cst_33 : f32 to vector<16x1xf32>
    %75 = arith.maximumf %74, %69 : vector<16x1xf32>
    %76 = vector.broadcast %cst_34 : f32 to vector<16x1xf32>
    %77 = arith.minimumf %76, %75 : vector<16x1xf32>
    %78 = math.exp %73 : vector<16x1xf32>
    %79 = arith.mulf %46, %78 : vector<16x1xf32>
    %80 = math.exp %77 : vector<16x1xf32>
    %81 = arith.mulf %49, %80 : vector<16x1xf32>
    %82 = arith.mulf %46, %54 : vector<16x1xf32>
    %83 = arith.addf %38, %82 : vector<16x1xf32>
    %84 = arith.mulf %49, %59 : vector<16x1xf32>
    %85 = arith.addf %43, %84 : vector<16x1xf32>
    %cst_35 = arith.constant 5.000000e-01 : f32
    %86 = vector.broadcast %cst_35 : f32 to vector<16x1xf32>
    %87 = arith.mulf %79, %86 : vector<16x1xf32>
    %88 = arith.subf %83, %87 : vector<16x1xf32>
    %cst_36 = arith.constant 0.000000e+00 : f32
    %cst_37 = arith.constant 6.400000e+01 : f32
    %89 = vector.broadcast %cst_36 : f32 to vector<16x1xf32>
    %90 = arith.maximumf %89, %88 : vector<16x1xf32>
    %91 = vector.broadcast %cst_37 : f32 to vector<16x1xf32>
    %92 = arith.minimumf %91, %90 : vector<16x1xf32>
    %cst_38 = arith.constant 5.000000e-01 : f32
    %93 = vector.broadcast %cst_38 : f32 to vector<16x1xf32>
    %94 = arith.mulf %81, %93 : vector<16x1xf32>
    %95 = arith.subf %85, %94 : vector<16x1xf32>
    %cst_39 = arith.constant 0.000000e+00 : f32
    %cst_40 = arith.constant 6.400000e+01 : f32
    %96 = vector.broadcast %cst_39 : f32 to vector<16x1xf32>
    %97 = arith.maximumf %96, %95 : vector<16x1xf32>
    %98 = vector.broadcast %cst_40 : f32 to vector<16x1xf32>
    %99 = arith.minimumf %98, %97 : vector<16x1xf32>
    %cst_41 = arith.constant 5.000000e-01 : f32
    %100 = vector.broadcast %cst_41 : f32 to vector<16x1xf32>
    %101 = arith.mulf %79, %100 : vector<16x1xf32>
    %102 = arith.addf %83, %101 : vector<16x1xf32>
    %cst_42 = arith.constant 0.000000e+00 : f32
    %cst_43 = arith.constant 6.400000e+01 : f32
    %103 = vector.broadcast %cst_42 : f32 to vector<16x1xf32>
    %104 = arith.maximumf %103, %102 : vector<16x1xf32>
    %105 = vector.broadcast %cst_43 : f32 to vector<16x1xf32>
    %106 = arith.minimumf %105, %104 : vector<16x1xf32>
    %cst_44 = arith.constant 5.000000e-01 : f32
    %107 = vector.broadcast %cst_44 : f32 to vector<16x1xf32>
    %108 = arith.mulf %81, %107 : vector<16x1xf32>
    %109 = arith.addf %85, %108 : vector<16x1xf32>
    %cst_45 = arith.constant 0.000000e+00 : f32
    %cst_46 = arith.constant 6.400000e+01 : f32
    %110 = vector.broadcast %cst_45 : f32 to vector<16x1xf32>
    %111 = arith.maximumf %110, %109 : vector<16x1xf32>
    %112 = vector.broadcast %cst_46 : f32 to vector<16x1xf32>
    %113 = arith.minimumf %112, %111 : vector<16x1xf32>
    %c0_47 = arith.constant 0 : index
    %c0_48 = arith.constant 0 : index
    %114 = vector.load %arg8[%c0_47, %c0_48] : memref<16x128xf32, #tpu.memory_space<vmem>>, vector<16x128xf32>
    tpu.vector_store %arg8[%c0_47, %c0_48], %21 {strides = array<i32>} : memref<16x128xf32, #tpu.memory_space<vmem>>, vector<16x128xf32>,
    %c0_49 = arith.constant 0 : index
    %c16 = arith.constant 16 : index
    %115 = vector.load %arg8[%c0_49, %c16] : memref<16x128xf32, #tpu.memory_space<vmem>>, vector<16x5xf32>
    tpu.vector_store %arg8[%c0_49, %c16], %32 {strides = array<i32>} : memref<16x128xf32, #tpu.memory_space<vmem>>, vector<16x5xf32>,
    %c0_50 = arith.constant 0 : index
    %c24 = arith.constant 24 : index
    %116 = vector.load %arg8[%c0_50, %c24] : memref<16x128xf32, #tpu.memory_space<vmem>>, vector<16x1xf32>
    tpu.vector_store %arg8[%c0_50, %c24], %92 {strides = array<i32>} : memref<16x128xf32, #tpu.memory_space<vmem>>, vector<16x1xf32>,
    %c0_51 = arith.constant 0 : index
    %c25 = arith.constant 25 : index
    %117 = vector.load %arg8[%c0_51, %c25] : memref<16x128xf32, #tpu.memory_space<vmem>>, vector<16x1xf32>
    tpu.vector_store %arg8[%c0_51, %c25], %99 {strides = array<i32>} : memref<16x128xf32, #tpu.memory_space<vmem>>, vector<16x1xf32>,
    %c0_52 = arith.constant 0 : index
    %c26 = arith.constant 26 : index
    %118 = vector.load %arg8[%c0_52, %c26] : memref<16x128xf32, #tpu.memory_space<vmem>>, vector<16x1xf32>
    tpu.vector_store %arg8[%c0_52, %c26], %106 {strides = array<i32>} : memref<16x128xf32, #tpu.memory_space<vmem>>, vector<16x1xf32>,
    %c0_53 = arith.constant 0 : index
    %c27 = arith.constant 27 : index
    %119 = vector.load %arg8[%c0_53, %c27] : memref<16x128xf32, #tpu.memory_space<vmem>>, vector<16x1xf32>
    tpu.vector_store %arg8[%c0_53, %c27], %113 {strides = array<i32>} : memref<16x128xf32, #tpu.memory_space<vmem>>, vector<16x1xf32>,
    return
  }
}

</mosaic_0001>

<bundles_post_ra>
// kernel: _lambda_.4
= control target key start
LH: loop header
LB: loop body
LE: loop exit
PB: predicated region body
PF: predicated region fallthrough
CT: control target
= control target key end

     0   :  { %v634_v19 = vmov 0.0   ;;  %vm635_vm0 = vmmov 0   ;;  %vm244_vm1 = vcmask 261120   ;;  %s636_s27 = smov 2   ;;  %vm359_vm2 = vcmask 39936   ;;  %s638_s13 = smov 120   ;;  %s831_s2 = inlined_call_operand.vmem [shape: bf16[256,32], index: 2, kind: input, shape index: {}]   ;;  %s832_s0 = inlined_call_operand.vmem [shape: bf16[16,256], index: 0, kind: input, shape index: {}]   ;;  %s833_s4 = inlined_call_operand.vmem [shape: bf16[32,32], index: 4, kind: input, shape index: {}]   ;;  %s834_s3 = inlined_call_operand.vmem [shape: f32[1,32], index: 3, kind: input, shape index: {}, may-alias: {3,5}]   ;;  %s835_s6 = inlined_call_operand.vmem [shape: bf16[32,128], index: 6, kind: input, shape index: {}]   ;;  %s836_s1 = inlined_call_operand.vmem [shape: f32[16,4], index: 1, kind: input, shape index: {}]   ;;  %s837_s5 = inlined_call_operand.vmem [shape: f32[1,32], index: 5, kind: input, shape index: {}, may-alias: {3,5}]   ;;  %s838_s7 = inlined_call_operand.vmem [shape: f32[1,128], index: 7, kind: input, shape index: {}]   ;;  %s839_s8 = inlined_call_operand.vmem [shape: f32[16,128], index: 8, kind: output, shape index: {}]  }
   0x1   :  { %v599_v0 = vld [vmem:[%s831_s2 + $0x40] sm:$0xff]   ;;  %v601_v2 = vld [vmem:[%s831_s2 + $0x48] sm:$0xff]   ;;  %v603_v4 = vld [vmem:[%s831_s2 + $0x50] sm:$0xff]   ;;  %574 = vmatprep.subr.bf16.mxu1 %v634_v19  ;;  %578 = vmatprep.mubr.msk.bf16.mxu1 %vm635_vm0, %v634_v19  ;;  %s639_s14 = smov 126   ;;  %s640_s15 = smov 24   ;;  %vm482_vm3 = vcmask 171136  }
   0x2   :  { %v600_v1 = vld [vmem:[%s831_s2] sm:$0xff]   ;;  %546 = vmatprep.subr.bf16.mxu0 %v599_v0  ;;  %v602_v3 = vld [vmem:[%s831_s2 + $0x8] sm:$0xff]   ;;  %v604_v5 = vld [vmem:[%s831_s2 + $0x10] sm:$0xff]   ;;  %s641_s16 = smov 16   ;;  %s642_s17 = smov 26   ;;  %vm493_vm4 = vcmask 203968  }
   0x3   :  { %547 = vmatpush3.bf16.msra.mxu0 %v600_v1  ;;  %v605_v6 = vld [vmem:[%s831_s2 + $0x58] sm:$0xff]   ;;  %v607_v8 = vld [vmem:[%s831_s2 + $0x60] sm:$0xff]   ;;  %v609_v10 = vld [vmem:[%s831_s2 + $0x68] sm:$0xff]   ;;  %vm496_vm5 = vcmask 212168   ;;  %vm507_vm6 = vcmask 220368   ;;  %vm510_vm7 = vcmask 228568  }
   0x4   :  { %548 = vmatprep.subr.bf16.mxu0 %v601_v2  ;;  %v606_v7 = vld [vmem:[%s831_s2 + $0x18] sm:$0xff]   ;;  %v608_v9 = vld [vmem:[%s831_s2 + $0x20] sm:$0xff]   ;;  %v610_v12 = vld [vmem:[%s831_s2 + $0x28] sm:$0xff]  }
   0x5   :  { %v617_v11 = vld [vmem:[%s832_s0 + $0x4] ss:$8 sps:$4 sm:$0xff]   ;;  %v611_v13 = vld [vmem:[%s831_s2 + $0x70] sm:$0xff]   ;;  %v613_v15 = vld [vmem:[%s831_s2 + $0x78] sm:$0xff]  }
   0x6   :  { %209 = vmatprep.mubr.bf16.mxu0 %v617_v11  ;;  %v612_v14 = vld [vmem:[%s831_s2 + $0x30] sm:$0xff]   ;;  %v614_v16 = vld [vmem:[%s831_s2 + $0x38] sm:$0xff]   ;;  %v615_v17 = vld [vmem:[%s832_s0] ss:$8 sps:$4 sm:$0xff]  }
   0x7   :  { %549 = vmatpush3.bf16.msra.mxu0 %v602_v3  ;;  %v618_v18 = vld [vmem:[%s833_s4] sm:$0xff]   ;;  %v619_v20 = vld [vmem:[%s833_s4 + $0x8] sm:$0xff]  }
   0x8   :  { %550 = vmatprep.subr.bf16.mxu0 %v603_v4  ;;  %575 = vmatpush3.bf16.msra.mxu1 %v618_v18  ;;  %v517_v22 = vld [vmem:[%s834_s3] ss:$0 sm:$0xff]  ;;  %v621_v34 = vld [vmem:[%s835_s6 + $0x8] sm:$0xff]  }
   0x9   :  { %576 = vmatprep.subr.bf16.mxu1 %v634_v19  ;;  %v620_v33 = vld [vmem:[%s835_s6] sm:$0xff]   ;;  %v773_v46 = vld [vmem:[%s836_s1 + $0x8] sm:$0xff] }
   0xa   :  { %v763_v35 = vld [vmem:[%s836_s1] sm:$0xff]  ;;  %s637_s1 = smov 122  }
   0xb   :  { %551 = vmatpush3.bf16.msra.mxu0 %v604_v5  ;;  %396 = vrot.lane.b32.xlu1 %v763_v35, %s636_s27  ;;  %v536_v36 = vld [vmem:[%s837_s5] ss:$0 sm:$0xff] }
   0xc   :  { %552 = vmatprep.subr.bf16.mxu0 %v605_v6  ;;  %577 = vmatpush3.bf16.msra.mxu1 %v619_v20  ;;  %v540_v47 = vld [vmem:[%s838_s7] ss:$0 sm:$0xff] }
   0xd   :  { %582 = vmatprep.subr.bf16.mxu1 %v634_v19 }
   0xf   :  { %553 = vmatpush3.bf16.msra.mxu0 %v606_v7  ;;  %398 = vrot.lane.b32.xlu1 %v773_v46, %s636_s27 }
  0x10   :  { %554 = vmatprep.subr.bf16.mxu0 %v607_v8 }
  0x13   :  { %555 = vmatpush3.bf16.msra.mxu0 %v608_v9 }
  0x14   :  { %556 = vmatprep.subr.bf16.mxu0 %v609_v10 }
  0x17   :  { %557 = vmatpush3.bf16.msra.mxu0 %v610_v12 }
  0x18   :  { %558 = vmatprep.subr.bf16.mxu0 %v611_v13 }
  0x1b   :  { %559 = vmatpush3.bf16.msra.mxu0 %v612_v14 }
  0x1c   :  { %560 = vmatprep.subr.bf16.mxu0 %v613_v15 }
  0x1f   :  { %561 = vmatpush3.bf16.msra.mxu0 %v614_v16 }
  0x22   :  { %210 = vmatmul.mubr.bf16.vlgmr.msra.gmra.mrb[0].mxu0 %v615_v17 }
  0x7d   :  { %v397_v2 = vpop.permute.xlu1 %396 }
  0x7e   :  { %v402_v4 = vsub.f32 %v763_v35, %v397_v2 }
  0x81   :  { %v399_v3 = vpop.permute.xlu1 %398 }
  0x82   :  { %v403_v7 = vsub.f32 %v773_v46, %v399_v3 }
  0xf5   :  { %v562_v21 = vpop.f32.mrb[0].mxu0 }
  0xf6   :  { %v563_v23 = vpop.f32.mrb[1].mxu0 }
  0xf7   :  { %v564_v24 = vadd.f32 %v563_v23, %v562_v21  ;;  %v565_v25 = vpop.f32.mrb[2].mxu0 }
  0xf8   :  { %v566_v26 = vpop.f32.mrb[3].mxu0 }
  0xf9   :  { %v212_v27 = vadd.f32 %v564_v24, %v517_v22  ;;  %v567_v28 = vadd.f32 %v566_v26, %v565_v25 }
  0xfb   :  { %v215_v29 = vadd.f32 %v567_v28, %v517_v22  ;;  %v218_v30 = vmax.f32 %v212_v27, 0.0 }
  0xfd   :  { %v219_v31 = vmax.f32 %v215_v29, 0.0 }
  0xff   :  { %v220_v32 = vpack.c.bf16 %v219_v31, %v218_v30 }
 0x101   :  { %579 = vmatmul.mubr.msk.bf16.vlgmr.msra.gmra.mrb[0].mxu1 %vm244_vm1, %v220_v32 }
 0x102   :  { %586 = vmatprep.mubr.msk.bf16.mxu1 %vm635_vm0, %v634_v19  ;;  %583 = vmatpush3.bf16.msra.mxu1 %v620_v33 }
 0x103   :  { %584 = vmatprep.subr.bf16.mxu1 %v634_v19 }
 0x106   :  { %585 = vmatpush3.bf16.msra.mxu1 %v621_v34 }
 0x1d4   :  { %v282_v37 = vpop.f32.mrb[0].mxu1 }
 0x1d5   :  { %v283_v38 = vadd.f32 %v536_v36, %v282_v37  ;;  %v580_v39 = vpop.f32.mrb[1].mxu1 }
 0x1d6   :  { %v285_v40 = vpop.f32.mrb[2].mxu1 }
 0x1d7   :  { %v286_v41 = vadd.f32 %v536_v36, %v285_v40  ;;  %v581_v42 = vpop.f32.mrb[3].mxu1  ;;  %v289_v43 = vmax.f32 %v283_v38, 0.0 }
 0x1d9   :  { %v290_v44 = vmax.f32 %v286_v41, 0.0 }
 0x1db   :  { %v291_v45 = vpack.c.bf16 %v290_v44, %v289_v43 }
 0x1dd   :  { %587 = vmatmul.mubr.msk.bf16.vlgmr.msra.gmra.mrb[4].mxu1 %vm244_vm1, %v291_v45 }
 0x2b0   :  { %v352_v48 = vpop.f32.mrb[4].mxu1 }
 0x2b1   :  { %v353_v49 = vadd.f32 %v540_v47, %v352_v48  ;;  %v588_v50 = vpop.f32.mrb[5].mxu1 }
 0x2b2   :  { %v355_v51 = vpop.f32.mrb[6].mxu1 }
 0x2b3   :  { %v356_v52 = vadd.f32 %v540_v47, %v355_v51  ;;  %v589_v53 = vpop.f32.mrb[7].mxu1  ;;  %v360_v54 = vsel %vm359_vm2, %v353_v49, -inf  ;;  %v404_v55 = vmul.f32 0.05, %v353_v49  ;;  %472 = vst [vmem:[%s839_s8] sm:$0xff] %v353_v49  ;;  %v408_v57 = vmul.f32 0.1, %v353_v49 }
 0x2b4   :  { %361 = vmax.xlane.f32.xlu0 %v360_v54 }
 0x2b5   :  { %v409_v56 = vmul.f32 0.1, %v356_v52  ;;  %432 = vrot.lane.b32.xlu1 %v404_v55, %s637_s1  ;;  %473 = vst [vmem:[%s839_s8 + $0x8] sm:$0xff] %v356_v52  ;;  %v363_v59 = vsel %vm359_vm2, %v356_v52, -inf  ;;  %v405_v60 = vmul.f32 0.05, %v356_v52 }
 0x2b6   :  { %v544_v62 = vclamps-f32 %v408_v57, 4.1351666 }
 0x2b7   :  { %v545_v58 = vclamps-f32 %v409_v56, 4.1351666 }
 0x2b8   :  { %364 = vmax.xlane.f32.xlu0 %v363_v59  ;;  %v416_v63 = vmul.f32 1.442695, %v544_v62 }
 0x2b9   :  { %v418_v61 = vmul.f32 1.442695, %v545_v58  ;;  %434 = vrot.lane.b32.xlu1 %v405_v60, %s637_s1 }
 0x2bb   :  { %622 = vpow2.f32 %v418_v61 }
 0x2bc   :  { %624 = vpow2.f32 %v416_v63 }
 0x2c5   :  { %v623_v0 = vpop.eup %622 }
 0x2c6   :  { %424 = vrot.lane.b32.xlu1 %v623_v0, %s638_s13  ;;  %v625_v1 = vpop.eup %624 }
 0x2ca   :  { %386 = vrot.lane.b32.xlu1 %v763_v35, %s639_s14 }
 0x2ce   :  { %422 = vrot.lane.b32.xlu0 %v625_v1, %s638_s13 }
 0x2d2   :  { %388 = vrot.lane.b32.xlu0 %v773_v46, %s639_s14 }
 0x327   :  { %v433_v5 = vpop.permute.xlu1 %432 }
 0x328   :  { %v438_v6 = vmul.f32 %v433_v5, %v402_v4 }
 0x32a   :  { %442 = vrot.lane.b32.xlu1 %v438_v6, %s639_s14 }
 0x32b   :  { %v435_v8 = vpop.permute.xlu1 %434 }
 0x32c   :  { %v439_v9 = vmul.f32 %v435_v8, %v403_v7 }
 0x32e   :  { %444 = vrot.lane.b32.xlu1 %v439_v9, %s639_s14 }
 0x338   :  { %v425_v23 = vpop.permute.xlu1 %424 }
 0x339   :  { %v429_v24 = vmul.f32 %v425_v23, %v403_v7 }
 0x33b   :  { %v451_v25 = vmul.f32 0.5, %v429_v24 }
 0x33c   :  { %v387_v26 = vpop.permute.xlu1 %386 }
 0x33d   :  { %v392_v28 = vadd.f32 %v387_v26, %v763_v35 }
 0x33f   :  { %v394_v31 = vmul.f32 0.5, %v392_v28 }
 0x341   :  { %v362_v10 = vpop.xlane.xlu0 %361 }
 0x342   :  { %v366_v11 = vsub.f32 %v353_v49, %v362_v10 }
 0x344   :  { %v368_v12 = vmul.f32 1.442695, %v366_v11 }
 0x345   :  { %v365_v13 = vpop.xlane.xlu0 %364 }
 0x346   :  { %626 = vpow2.f32 %v368_v12  ;;  %v367_v14 = vsub.f32 %v356_v52, %v365_v13 }
 0x348   :  { %v370_v15 = vmul.f32 1.442695, %v367_v14 }
 0x349   :  { %v423_v20 = vpop.permute.xlu0 %422 }
 0x34a   :  { %628 = vpow2.f32 %v370_v15  ;;  %v428_v21 = vmul.f32 %v423_v20, %v402_v4 }
 0x34c   :  { %v450_v22 = vmul.f32 0.5, %v428_v21 }
 0x34d   :  { %v389_v29 = vpop.permute.xlu0 %388 }
 0x34e   :  { %v393_v32 = vadd.f32 %v389_v29, %v773_v46 }
 0x350   :  { %v627_v16 = vpop.eup %626  ;;  %v395_v36 = vmul.f32 0.5, %v393_v32 }
 0x351   :  { %v372_v17 = vsel %vm359_vm2, %v627_v16, 0.0 }
 0x352   :  { %373 = vadd.xlane.f32.xlu1 %v372_v17 }
 0x354   :  { %v629_v18 = vpop.eup %628 }
 0x355   :  { %v375_v19 = vsel %vm359_vm2, %v629_v18, 0.0 }
 0x356   :  { %376 = vadd.xlane.f32.xlu0 %v375_v19 }
 0x363   :  { %454 = vrot.lane.b32.xlu1 %v450_v22, %s639_s14 }
 0x36c   :  { %456 = vrot.lane.b32.xlu0 %v451_v25, %s639_s14 }
 0x39c   :  { %v443_v27 = vpop.permute.xlu1 %442 }
 0x39d   :  { %v448_v34 = vadd.f32 %v443_v27, %v394_v31 }
 0x3a0   :  { %v445_v30 = vpop.permute.xlu1 %444 }
 0x3a1   :  { %v449_v40 = vadd.f32 %v445_v30, %v395_v36 }
 0x3df   :  { %v374_v33 = vpop.xlane.xlu1 %373 }
 0x3e0   :  { %630 = vrcp.f32 %v374_v33 }
 0x3e3   :  { %v455_v37 = vpop.permute.xlu1 %454  ;;  %v377_v38 = vpop.xlane.xlu0 %376 }
 0x3e4   :  { %v460_v39 = vsub.f32 %v448_v34, %v455_v37  ;;  %632 = vrcp.f32 %v377_v38  ;;  %v466_v44 = vadd.f32 %v455_v37, %v448_v34 }
 0x3e6   :  { %v462_v41 = vmax.f32 %v460_v39, 0.0  ;;  %v468_v46 = vmax.f32 %v466_v44, 0.0 }
 0x3e7   :  { %v457_v42 = vpop.permute.xlu0 %456 }
 0x3e8   :  { %v464_v43 = vmin.f32 %v462_v41, 64.0  ;;  %v461_v45 = vsub.f32 %v449_v40, %v457_v42  ;;  %v467_v50 = vadd.f32 %v457_v42, %v449_v40  ;;  %v470_v53 = vmin.f32 %v468_v46, 64.0 }
 0x3ea   :  { %v631_v35 = vpop.eup %630  ;;  %v463_v47 = vmax.f32 %v461_v45, 0.0  ;;  %487 = vrot.lane.b32.xlu1 %v464_v43, %s640_s15  ;;  %v469_v54 = vmax.f32 %v467_v50, 0.0 }
 0x3eb   :  { %v379_v48 = vmul.f32 %v631_v35, %v627_v16 }
 0x3ec   :  { %v465_v49 = vmin.f32 %v463_v47, 64.0  ;;  %v471_v55 = vmin.f32 %v469_v54, 64.0 }
 0x3ee   :  { %v633_v51 = vpop.eup %632  ;;  %476 = vrot.lane.b32.xlu1 %v379_v48, %s641_s16  ;;  %489 = vrot.lane.b32.xlu0 %v465_v49, %s640_s15 }
 0x3ef   :  { %v381_v52 = vmul.f32 %v633_v51, %v629_v18 }
 0x3f2   :  { %501 = vrot.lane.b32.xlu1 %v470_v53, %s642_s17  ;;  %478 = vrot.lane.b32.xlu0 %v381_v52, %s641_s16 }
 0x3f6   :  { %503 = vrot.lane.b32.xlu0 %v471_v55, %s642_s17 }
 0x45c   :  { %v488_v56 = vpop.permute.xlu1 %487 }
 0x460   :  { %v477_v57 = vpop.permute.xlu1 %476  ;;  %v490_v58 = vpop.permute.xlu0 %489 }
 0x461   :  { %483 = vst.msk [vmem:[%s839_s8] sm:$0xff] %vm482_vm3, %v477_v57 }
 0x462   :  { %494 = vst.msk [vmem:[%s839_s8] sm:$0xff] %vm493_vm4, %v488_v56 }
 0x463   :  { %497 = vst.msk [vmem:[%s839_s8] sm:$0xff] %vm496_vm5, %v488_v56 }
 0x464   :  { %v502_v59 = vpop.permute.xlu1 %501  ;;  %v479_v60 = vpop.permute.xlu0 %478 }
 0x465   :  { %508 = vst.msk [vmem:[%s839_s8] sm:$0xff] %vm507_vm6, %v502_v59 }
 0x466   :  { %484 = vst.msk [vmem:[%s839_s8 + $0x8] sm:$0xff] %vm482_vm3, %v479_v60 }
 0x467   :  { %511 = vst.msk [vmem:[%s839_s8] sm:$0xff] %vm510_vm7, %v502_v59 }
 0x468   :  { %495 = vst.msk [vmem:[%s839_s8 + $0x8] sm:$0xff] %vm493_vm4, %v490_v58  ;;  %v504_v61 = vpop.permute.xlu0 %503 }
 0x469   :  { %498 = vst.msk [vmem:[%s839_s8 + $0x8] sm:$0xff] %vm496_vm5, %v490_v58 }
 0x46a   :  { %509 = vst.msk [vmem:[%s839_s8 + $0x8] sm:$0xff] %vm507_vm6, %v504_v61 }
 0x46b   :  { %512 = vst.msk [vmem:[%s839_s8 + $0x8] sm:$0xff] %vm510_vm7, %v504_v61 }

// kernel: _lambda_.3
= control target key start
LH: loop header
LB: loop body
LE: loop exit
PB: predicated region body
PF: predicated region fallthrough
CT: control target
= control target key end

     0   :  { %v634_v19 = vmov 0.0   ;;  %vm635_vm0 = vmmov 0   ;;  %vm244_vm1 = vcmask 261120   ;;  %s636_s27 = smov 2   ;;  %vm359_vm2 = vcmask 39936   ;;  %s638_s13 = smov 120   ;;  %s831_s2 = inlined_call_operand.vmem [shape: bf16[256,32], index: 2, kind: input, shape index: {}]   ;;  %s832_s0 = inlined_call_operand.vmem [shape: bf16[16,256], index: 0, kind: input, shape index: {}]   ;;  %s833_s4 = inlined_call_operand.vmem [shape: bf16[32,32], index: 4, kind: input, shape index: {}]   ;;  %s834_s3 = inlined_call_operand.vmem [shape: f32[1,32], index: 3, kind: input, shape index: {}, may-alias: {3,5}]   ;;  %s835_s6 = inlined_call_operand.vmem [shape: bf16[32,128], index: 6, kind: input, shape index: {}]   ;;  %s836_s1 = inlined_call_operand.vmem [shape: f32[16,4], index: 1, kind: input, shape index: {}]   ;;  %s837_s5 = inlined_call_operand.vmem [shape: f32[1,32], index: 5, kind: input, shape index: {}, may-alias: {3,5}]   ;;  %s838_s7 = inlined_call_operand.vmem [shape: f32[1,128], index: 7, kind: input, shape index: {}]   ;;  %s839_s8 = inlined_call_operand.vmem [shape: f32[16,128], index: 8, kind: output, shape index: {}]  }
   0x1   :  { %v599_v0 = vld [vmem:[%s831_s2 + $0x40] sm:$0xff]   ;;  %v601_v2 = vld [vmem:[%s831_s2 + $0x48] sm:$0xff]   ;;  %v603_v4 = vld [vmem:[%s831_s2 + $0x50] sm:$0xff]   ;;  %574 = vmatprep.subr.bf16.mxu1 %v634_v19  ;;  %578 = vmatprep.mubr.msk.bf16.mxu1 %vm635_vm0, %v634_v19  ;;  %s639_s14 = smov 126   ;;  %s640_s15 = smov 24   ;;  %vm482_vm3 = vcmask 171136  }
   0x2   :  { %v600_v1 = vld [vmem:[%s831_s2] sm:$0xff]   ;;  %546 = vmatprep.subr.bf16.mxu0 %v599_v0  ;;  %v602_v3 = vld [vmem:[%s831_s2 + $0x8] sm:$0xff]   ;;  %v604_v5 = vld [vmem:[%s831_s2 + $0x10] sm:$0xff]   ;;  %s641_s16 = smov 16   ;;  %s642_s17 = smov 26   ;;  %vm493_vm4 = vcmask 203968  }
   0x3   :  { %547 = vmatpush3.bf16.msra.mxu0 %v600_v1  ;;  %v605_v6 = vld [vmem:[%s831_s2 + $0x58] sm:$0xff]   ;;  %v607_v8 = vld [vmem:[%s831_s2 + $0x60] sm:$0xff]   ;;  %v609_v10 = vld [vmem:[%s831_s2 + $0x68] sm:$0xff]   ;;  %vm496_vm5 = vcmask 212168   ;;  %vm507_vm6 = vcmask 220368   ;;  %vm510_vm7 = vcmask 228568  }
   0x4   :  { %548 = vmatprep.subr.bf16.mxu0 %v601_v2  ;;  %v606_v7 = vld [vmem:[%s831_s2 + $0x18] sm:$0xff]   ;;  %v608_v9 = vld [vmem:[%s831_s2 + $0x20] sm:$0xff]   ;;  %v610_v12 = vld [vmem:[%s831_s2 + $0x28] sm:$0xff]  }
   0x5   :  { %v617_v11 = vld [vmem:[%s832_s0 + $0x4] ss:$8 sps:$4 sm:$0xff]   ;;  %v611_v13 = vld [vmem:[%s831_s2 + $0x70] sm:$0xff]   ;;  %v613_v15 = vld [vmem:[%s831_s2 + $0x78] sm:$0xff]  }
   0x6   :  { %209 = vmatprep.mubr.bf16.mxu0 %v617_v11  ;;  %v612_v14 = vld [vmem:[%s831_s2 + $0x30] sm:$0xff]   ;;  %v614_v16 = vld [vmem:[%s831_s2 + $0x38] sm:$0xff]   ;;  %v615_v17 = vld [vmem:[%s832_s0] ss:$8 sps:$4 sm:$0xff]  }
   0x7   :  { %549 = vmatpush3.bf16.msra.mxu0 %v602_v3  ;;  %v618_v18 = vld [vmem:[%s833_s4] sm:$0xff]   ;;  %v619_v20 = vld [vmem:[%s833_s4 + $0x8] sm:$0xff]  }
   0x8   :  { %550 = vmatprep.subr.bf16.mxu0 %v603_v4  ;;  %575 = vmatpush3.bf16.msra.mxu1 %v618_v18  ;;  %v517_v22 = vld [vmem:[%s834_s3] ss:$0 sm:$0xff]  ;;  %v621_v34 = vld [vmem:[%s835_s6 + $0x8] sm:$0xff]  }
   0x9   :  { %576 = vmatprep.subr.bf16.mxu1 %v634_v19  ;;  %v620_v33 = vld [vmem:[%s835_s6] sm:$0xff]   ;;  %v773_v46 = vld [vmem:[%s836_s1 + $0x8] sm:$0xff] }
   0xa   :  { %v763_v35 = vld [vmem:[%s836_s1] sm:$0xff]  ;;  %s637_s1 = smov 122  }
   0xb   :  { %551 = vmatpush3.bf16.msra.mxu0 %v604_v5  ;;  %396 = vrot.lane.b32.xlu1 %v763_v35, %s636_s27  ;;  %v536_v36 = vld [vmem:[%s837_s5] ss:$0 sm:$0xff] }
   0xc   :  { %552 = vmatprep.subr.bf16.mxu0 %v605_v6  ;;  %577 = vmatpush3.bf16.msra.mxu1 %v619_v20  ;;  %v540_v47 = vld [vmem:[%s838_s7] ss:$0 sm:$0xff] }
   0xd   :  { %582 = vmatprep.subr.bf16.mxu1 %v634_v19 }
   0xf   :  { %553 = vmatpush3.bf16.msra.mxu0 %v606_v7  ;;  %398 = vrot.lane.b32.xlu1 %v773_v46, %s636_s27 }
  0x10   :  { %554 = vmatprep.subr.bf16.mxu0 %v607_v8 }
  0x13   :  { %555 = vmatpush3.bf16.msra.mxu0 %v608_v9 }
  0x14   :  { %556 = vmatprep.subr.bf16.mxu0 %v609_v10 }
  0x17   :  { %557 = vmatpush3.bf16.msra.mxu0 %v610_v12 }
  0x18   :  { %558 = vmatprep.subr.bf16.mxu0 %v611_v13 }
  0x1b   :  { %559 = vmatpush3.bf16.msra.mxu0 %v612_v14 }
  0x1c   :  { %560 = vmatprep.subr.bf16.mxu0 %v613_v15 }
  0x1f   :  { %561 = vmatpush3.bf16.msra.mxu0 %v614_v16 }
  0x22   :  { %210 = vmatmul.mubr.bf16.vlgmr.msra.gmra.mrb[0].mxu0 %v615_v17 }
  0x7d   :  { %v397_v2 = vpop.permute.xlu1 %396 }
  0x7e   :  { %v402_v4 = vsub.f32 %v763_v35, %v397_v2 }
  0x81   :  { %v399_v3 = vpop.permute.xlu1 %398 }
  0x82   :  { %v403_v7 = vsub.f32 %v773_v46, %v399_v3 }
  0xf5   :  { %v562_v21 = vpop.f32.mrb[0].mxu0 }
  0xf6   :  { %v563_v23 = vpop.f32.mrb[1].mxu0 }
  0xf7   :  { %v564_v24 = vadd.f32 %v563_v23, %v562_v21  ;;  %v565_v25 = vpop.f32.mrb[2].mxu0 }
  0xf8   :  { %v566_v26 = vpop.f32.mrb[3].mxu0 }
  0xf9   :  { %v212_v27 = vadd.f32 %v564_v24, %v517_v22  ;;  %v567_v28 = vadd.f32 %v566_v26, %v565_v25 }
  0xfb   :  { %v215_v29 = vadd.f32 %v567_v28, %v517_v22  ;;  %v218_v30 = vmax.f32 %v212_v27, 0.0 }
  0xfd   :  { %v219_v31 = vmax.f32 %v215_v29, 0.0 }
  0xff   :  { %v220_v32 = vpack.c.bf16 %v219_v31, %v218_v30 }
 0x101   :  { %579 = vmatmul.mubr.msk.bf16.vlgmr.msra.gmra.mrb[0].mxu1 %vm244_vm1, %v220_v32 }
 0x102   :  { %586 = vmatprep.mubr.msk.bf16.mxu1 %vm635_vm0, %v634_v19  ;;  %583 = vmatpush3.bf16.msra.mxu1 %v620_v33 }
 0x103   :  { %584 = vmatprep.subr.bf16.mxu1 %v634_v19 }
 0x106   :  { %585 = vmatpush3.bf16.msra.mxu1 %v621_v34 }
 0x1d4   :  { %v282_v37 = vpop.f32.mrb[0].mxu1 }
 0x1d5   :  { %v283_v38 = vadd.f32 %v536_v36, %v282_v37  ;;  %v580_v39 = vpop.f32.mrb[1].mxu1 }
 0x1d6   :  { %v285_v40 = vpop.f32.mrb[2].mxu1 }
 0x1d7   :  { %v286_v41 = vadd.f32 %v536_v36, %v285_v40  ;;  %v581_v42 = vpop.f32.mrb[3].mxu1  ;;  %v289_v43 = vmax.f32 %v283_v38, 0.0 }
 0x1d9   :  { %v290_v44 = vmax.f32 %v286_v41, 0.0 }
 0x1db   :  { %v291_v45 = vpack.c.bf16 %v290_v44, %v289_v43 }
 0x1dd   :  { %587 = vmatmul.mubr.msk.bf16.vlgmr.msra.gmra.mrb[4].mxu1 %vm244_vm1, %v291_v45 }
 0x2b0   :  { %v352_v48 = vpop.f32.mrb[4].mxu1 }
 0x2b1   :  { %v353_v49 = vadd.f32 %v540_v47, %v352_v48  ;;  %v588_v50 = vpop.f32.mrb[5].mxu1 }
 0x2b2   :  { %v355_v51 = vpop.f32.mrb[6].mxu1 }
 0x2b3   :  { %v356_v52 = vadd.f32 %v540_v47, %v355_v51  ;;  %v589_v53 = vpop.f32.mrb[7].mxu1  ;;  %v360_v54 = vsel %vm359_vm2, %v353_v49, -inf  ;;  %v404_v55 = vmul.f32 0.1, %v353_v49  ;;  %472 = vst [vmem:[%s839_s8] sm:$0xff] %v353_v49  ;;  %v408_v57 = vmul.f32 0.2, %v353_v49 }
 0x2b4   :  { %361 = vmax.xlane.f32.xlu0 %v360_v54 }
 0x2b5   :  { %v409_v56 = vmul.f32 0.2, %v356_v52  ;;  %432 = vrot.lane.b32.xlu1 %v404_v55, %s637_s1  ;;  %473 = vst [vmem:[%s839_s8 + $0x8] sm:$0xff] %v356_v52  ;;  %v363_v59 = vsel %vm359_vm2, %v356_v52, -inf  ;;  %v405_v60 = vmul.f32 0.1, %v356_v52 }
 0x2b6   :  { %v544_v62 = vclamps-f32 %v408_v57, 4.1351666 }
 0x2b7   :  { %v545_v58 = vclamps-f32 %v409_v56, 4.1351666 }
 0x2b8   :  { %364 = vmax.xlane.f32.xlu0 %v363_v59  ;;  %v416_v63 = vmul.f32 1.442695, %v544_v62 }
 0x2b9   :  { %v418_v61 = vmul.f32 1.442695, %v545_v58  ;;  %434 = vrot.lane.b32.xlu1 %v405_v60, %s637_s1 }
 0x2bb   :  { %622 = vpow2.f32 %v418_v61 }
 0x2bc   :  { %624 = vpow2.f32 %v416_v63 }
 0x2c5   :  { %v623_v0 = vpop.eup %622 }
 0x2c6   :  { %424 = vrot.lane.b32.xlu1 %v623_v0, %s638_s13  ;;  %v625_v1 = vpop.eup %624 }
 0x2ca   :  { %386 = vrot.lane.b32.xlu1 %v763_v35, %s639_s14 }
 0x2ce   :  { %422 = vrot.lane.b32.xlu0 %v625_v1, %s638_s13 }
 0x2d2   :  { %388 = vrot.lane.b32.xlu0 %v773_v46, %s639_s14 }
 0x327   :  { %v433_v5 = vpop.permute.xlu1 %432 }
 0x328   :  { %v438_v6 = vmul.f32 %v433_v5, %v402_v4 }
 0x32a   :  { %442 = vrot.lane.b32.xlu1 %v438_v6, %s639_s14 }
 0x32b   :  { %v435_v8 = vpop.permute.xlu1 %434 }
 0x32c   :  { %v439_v9 = vmul.f32 %v435_v8, %v403_v7 }
 0x32e   :  { %444 = vrot.lane.b32.xlu1 %v439_v9, %s639_s14 }
 0x338   :  { %v425_v23 = vpop.permute.xlu1 %424 }
 0x339   :  { %v429_v24 = vmul.f32 %v425_v23, %v403_v7 }
 0x33b   :  { %v451_v25 = vmul.f32 0.5, %v429_v24 }
 0x33c   :  { %v387_v26 = vpop.permute.xlu1 %386 }
 0x33d   :  { %v392_v28 = vadd.f32 %v387_v26, %v763_v35 }
 0x33f   :  { %v394_v31 = vmul.f32 0.5, %v392_v28 }
 0x341   :  { %v362_v10 = vpop.xlane.xlu0 %361 }
 0x342   :  { %v366_v11 = vsub.f32 %v353_v49, %v362_v10 }
 0x344   :  { %v368_v12 = vmul.f32 1.442695, %v366_v11 }
 0x345   :  { %v365_v13 = vpop.xlane.xlu0 %364 }
 0x346   :  { %626 = vpow2.f32 %v368_v12  ;;  %v367_v14 = vsub.f32 %v356_v52, %v365_v13 }
 0x348   :  { %v370_v15 = vmul.f32 1.442695, %v367_v14 }
 0x349   :  { %v423_v20 = vpop.permute.xlu0 %422 }
 0x34a   :  { %628 = vpow2.f32 %v370_v15  ;;  %v428_v21 = vmul.f32 %v423_v20, %v402_v4 }
 0x34c   :  { %v450_v22 = vmul.f32 0.5, %v428_v21 }
 0x34d   :  { %v389_v29 = vpop.permute.xlu0 %388 }
 0x34e   :  { %v393_v32 = vadd.f32 %v389_v29, %v773_v46 }
 0x350   :  { %v627_v16 = vpop.eup %626  ;;  %v395_v36 = vmul.f32 0.5, %v393_v32 }
 0x351   :  { %v372_v17 = vsel %vm359_vm2, %v627_v16, 0.0 }
 0x352   :  { %373 = vadd.xlane.f32.xlu1 %v372_v17 }
 0x354   :  { %v629_v18 = vpop.eup %628 }
 0x355   :  { %v375_v19 = vsel %vm359_vm2, %v629_v18, 0.0 }
 0x356   :  { %376 = vadd.xlane.f32.xlu0 %v375_v19 }
 0x363   :  { %454 = vrot.lane.b32.xlu1 %v450_v22, %s639_s14 }
 0x36c   :  { %456 = vrot.lane.b32.xlu0 %v451_v25, %s639_s14 }
 0x39c   :  { %v443_v27 = vpop.permute.xlu1 %442 }
 0x39d   :  { %v448_v34 = vadd.f32 %v443_v27, %v394_v31 }
 0x3a0   :  { %v445_v30 = vpop.permute.xlu1 %444 }
 0x3a1   :  { %v449_v40 = vadd.f32 %v445_v30, %v395_v36 }
 0x3df   :  { %v374_v33 = vpop.xlane.xlu1 %373 }
 0x3e0   :  { %630 = vrcp.f32 %v374_v33 }
 0x3e3   :  { %v455_v37 = vpop.permute.xlu1 %454  ;;  %v377_v38 = vpop.xlane.xlu0 %376 }
 0x3e4   :  { %v460_v39 = vsub.f32 %v448_v34, %v455_v37  ;;  %632 = vrcp.f32 %v377_v38  ;;  %v466_v44 = vadd.f32 %v455_v37, %v448_v34 }
 0x3e6   :  { %v462_v41 = vmax.f32 %v460_v39, 0.0  ;;  %v468_v46 = vmax.f32 %v466_v44, 0.0 }
 0x3e7   :  { %v457_v42 = vpop.permute.xlu0 %456 }
 0x3e8   :  { %v464_v43 = vmin.f32 %v462_v41, 64.0  ;;  %v461_v45 = vsub.f32 %v449_v40, %v457_v42  ;;  %v467_v50 = vadd.f32 %v457_v42, %v449_v40  ;;  %v470_v53 = vmin.f32 %v468_v46, 64.0 }
 0x3ea   :  { %v631_v35 = vpop.eup %630  ;;  %v463_v47 = vmax.f32 %v461_v45, 0.0  ;;  %487 = vrot.lane.b32.xlu1 %v464_v43, %s640_s15  ;;  %v469_v54 = vmax.f32 %v467_v50, 0.0 }
 0x3eb   :  { %v379_v48 = vmul.f32 %v631_v35, %v627_v16 }
 0x3ec   :  { %v465_v49 = vmin.f32 %v463_v47, 64.0  ;;  %v471_v55 = vmin.f32 %v469_v54, 64.0 }
 0x3ee   :  { %v633_v51 = vpop.eup %632  ;;  %476 = vrot.lane.b32.xlu1 %v379_v48, %s641_s16  ;;  %489 = vrot.lane.b32.xlu0 %v465_v49, %s640_s15 }
 0x3ef   :  { %v381_v52 = vmul.f32 %v633_v51, %v629_v18 }
 0x3f2   :  { %501 = vrot.lane.b32.xlu1 %v470_v53, %s642_s17  ;;  %478 = vrot.lane.b32.xlu0 %v381_v52, %s641_s16 }
 0x3f6   :  { %503 = vrot.lane.b32.xlu0 %v471_v55, %s642_s17 }
 0x45c   :  { %v488_v56 = vpop.permute.xlu1 %487 }
 0x460   :  { %v477_v57 = vpop.permute.xlu1 %476  ;;  %v490_v58 = vpop.permute.xlu0 %489 }
 0x461   :  { %483 = vst.msk [vmem:[%s839_s8] sm:$0xff] %vm482_vm3, %v477_v57 }
 0x462   :  { %494 = vst.msk [vmem:[%s839_s8] sm:$0xff] %vm493_vm4, %v488_v56 }
 0x463   :  { %497 = vst.msk [vmem:[%s839_s8] sm:$0xff] %vm496_vm5, %v488_v56 }
 0x464   :  { %v502_v59 = vpop.permute.xlu1 %501  ;;  %v479_v60 = vpop.permute.xlu0 %478 }
 0x465   :  { %508 = vst.msk [vmem:[%s839_s8] sm:$0xff] %vm507_vm6, %v502_v59 }
 0x466   :  { %484 = vst.msk [vmem:[%s839_s8 + $0x8] sm:$0xff] %vm482_vm3, %v479_v60 }
 0x467   :  { %511 = vst.msk [vmem:[%s839_s8] sm:$0xff] %vm510_vm7, %v502_v59 }
 0x468   :  { %495 = vst.msk [vmem:[%s839_s8 + $0x8] sm:$0xff] %vm493_vm4, %v490_v58  ;;  %v504_v61 = vpop.permute.xlu0 %503 }
 0x469   :  { %498 = vst.msk [vmem:[%s839_s8 + $0x8] sm:$0xff] %vm496_vm5, %v490_v58 }
 0x46a   :  { %509 = vst.msk [vmem:[%s839_s8 + $0x8] sm:$0xff] %vm507_vm6, %v504_v61 }
 0x46b   :  { %512 = vst.msk [vmem:[%s839_s8 + $0x8] sm:$0xff] %vm510_vm7, %v504_v61 }

// kernel: _lambda_.5
= control target key start
LH: loop header
LB: loop body
LE: loop exit
PB: predicated region body
PF: predicated region fallthrough
CT: control target
= control target key end

     0   :  { %v634_v19 = vmov 0.0   ;;  %vm635_vm0 = vmmov 0   ;;  %vm244_vm1 = vcmask 261120   ;;  %s636_s27 = smov 2   ;;  %vm359_vm2 = vcmask 39936   ;;  %s638_s13 = smov 120   ;;  %s831_s2 = inlined_call_operand.vmem [shape: bf16[256,32], index: 2, kind: input, shape index: {}]   ;;  %s832_s0 = inlined_call_operand.vmem [shape: bf16[16,256], index: 0, kind: input, shape index: {}]   ;;  %s833_s4 = inlined_call_operand.vmem [shape: bf16[32,32], index: 4, kind: input, shape index: {}]   ;;  %s834_s3 = inlined_call_operand.vmem [shape: f32[1,32], index: 3, kind: input, shape index: {}, may-alias: {3,5}]   ;;  %s835_s6 = inlined_call_operand.vmem [shape: bf16[32,128], index: 6, kind: input, shape index: {}]   ;;  %s836_s1 = inlined_call_operand.vmem [shape: f32[16,4], index: 1, kind: input, shape index: {}]   ;;  %s837_s5 = inlined_call_operand.vmem [shape: f32[1,32], index: 5, kind: input, shape index: {}, may-alias: {3,5}]   ;;  %s838_s7 = inlined_call_operand.vmem [shape: f32[1,128], index: 7, kind: input, shape index: {}]   ;;  %s839_s8 = inlined_call_operand.vmem [shape: f32[16,128], index: 8, kind: output, shape index: {}]  }
   0x1   :  { %v599_v0 = vld [vmem:[%s831_s2 + $0x40] sm:$0xff]   ;;  %v601_v2 = vld [vmem:[%s831_s2 + $0x48] sm:$0xff]   ;;  %v603_v4 = vld [vmem:[%s831_s2 + $0x50] sm:$0xff]   ;;  %574 = vmatprep.subr.bf16.mxu1 %v634_v19  ;;  %578 = vmatprep.mubr.msk.bf16.mxu1 %vm635_vm0, %v634_v19  ;;  %s639_s14 = smov 126   ;;  %s640_s15 = smov 24   ;;  %vm482_vm3 = vcmask 171136  }
   0x2   :  { %v600_v1 = vld [vmem:[%s831_s2] sm:$0xff]   ;;  %546 = vmatprep.subr.bf16.mxu0 %v599_v0  ;;  %v602_v3 = vld [vmem:[%s831_s2 + $0x8] sm:$0xff]   ;;  %v604_v5 = vld [vmem:[%s831_s2 + $0x10] sm:$0xff]   ;;  %s641_s16 = smov 16   ;;  %s642_s17 = smov 26   ;;  %vm493_vm4 = vcmask 203968  }
   0x3   :  { %547 = vmatpush3.bf16.msra.mxu0 %v600_v1  ;;  %v605_v6 = vld [vmem:[%s831_s2 + $0x58] sm:$0xff]   ;;  %v607_v8 = vld [vmem:[%s831_s2 + $0x60] sm:$0xff]   ;;  %v609_v10 = vld [vmem:[%s831_s2 + $0x68] sm:$0xff]   ;;  %vm496_vm5 = vcmask 212168   ;;  %vm507_vm6 = vcmask 220368   ;;  %vm510_vm7 = vcmask 228568  }
   0x4   :  { %548 = vmatprep.subr.bf16.mxu0 %v601_v2  ;;  %v606_v7 = vld [vmem:[%s831_s2 + $0x18] sm:$0xff]   ;;  %v608_v9 = vld [vmem:[%s831_s2 + $0x20] sm:$0xff]   ;;  %v610_v12 = vld [vmem:[%s831_s2 + $0x28] sm:$0xff]  }
   0x5   :  { %v617_v11 = vld [vmem:[%s832_s0 + $0x4] ss:$8 sps:$4 sm:$0xff]   ;;  %v611_v13 = vld [vmem:[%s831_s2 + $0x70] sm:$0xff]   ;;  %v613_v15 = vld [vmem:[%s831_s2 + $0x78] sm:$0xff]  }
   0x6   :  { %209 = vmatprep.mubr.bf16.mxu0 %v617_v11  ;;  %v612_v14 = vld [vmem:[%s831_s2 + $0x30] sm:$0xff]   ;;  %v614_v16 = vld [vmem:[%s831_s2 + $0x38] sm:$0xff]   ;;  %v615_v17 = vld [vmem:[%s832_s0] ss:$8 sps:$4 sm:$0xff]  }
   0x7   :  { %549 = vmatpush3.bf16.msra.mxu0 %v602_v3  ;;  %v618_v18 = vld [vmem:[%s833_s4] sm:$0xff]   ;;  %v619_v20 = vld [vmem:[%s833_s4 + $0x8] sm:$0xff]  }
   0x8   :  { %550 = vmatprep.subr.bf16.mxu0 %v603_v4  ;;  %575 = vmatpush3.bf16.msra.mxu1 %v618_v18  ;;  %v517_v22 = vld [vmem:[%s834_s3] ss:$0 sm:$0xff]  ;;  %v621_v34 = vld [vmem:[%s835_s6 + $0x8] sm:$0xff]  }
   0x9   :  { %576 = vmatprep.subr.bf16.mxu1 %v634_v19  ;;  %v620_v33 = vld [vmem:[%s835_s6] sm:$0xff]   ;;  %v773_v46 = vld [vmem:[%s836_s1 + $0x8] sm:$0xff] }
   0xa   :  { %v763_v35 = vld [vmem:[%s836_s1] sm:$0xff]  ;;  %s637_s1 = smov 122  }
   0xb   :  { %551 = vmatpush3.bf16.msra.mxu0 %v604_v5  ;;  %396 = vrot.lane.b32.xlu1 %v763_v35, %s636_s27  ;;  %v536_v36 = vld [vmem:[%s837_s5] ss:$0 sm:$0xff] }
   0xc   :  { %552 = vmatprep.subr.bf16.mxu0 %v605_v6  ;;  %577 = vmatpush3.bf16.msra.mxu1 %v619_v20  ;;  %v540_v47 = vld [vmem:[%s838_s7] ss:$0 sm:$0xff] }
   0xd   :  { %582 = vmatprep.subr.bf16.mxu1 %v634_v19 }
   0xf   :  { %553 = vmatpush3.bf16.msra.mxu0 %v606_v7  ;;  %398 = vrot.lane.b32.xlu1 %v773_v46, %s636_s27 }
  0x10   :  { %554 = vmatprep.subr.bf16.mxu0 %v607_v8 }
  0x13   :  { %555 = vmatpush3.bf16.msra.mxu0 %v608_v9 }
  0x14   :  { %556 = vmatprep.subr.bf16.mxu0 %v609_v10 }
  0x17   :  { %557 = vmatpush3.bf16.msra.mxu0 %v610_v12 }
  0x18   :  { %558 = vmatprep.subr.bf16.mxu0 %v611_v13 }
  0x1b   :  { %559 = vmatpush3.bf16.msra.mxu0 %v612_v14 }
  0x1c   :  { %560 = vmatprep.subr.bf16.mxu0 %v613_v15 }
  0x1f   :  { %561 = vmatpush3.bf16.msra.mxu0 %v614_v16 }
  0x22   :  { %210 = vmatmul.mubr.bf16.vlgmr.msra.gmra.mrb[0].mxu0 %v615_v17 }
  0x7d   :  { %v397_v2 = vpop.permute.xlu1 %396 }
  0x7e   :  { %v402_v4 = vsub.f32 %v763_v35, %v397_v2 }
  0x81   :  { %v399_v3 = vpop.permute.xlu1 %398 }
  0x82   :  { %v403_v7 = vsub.f32 %v773_v46, %v399_v3 }
  0xf5   :  { %v562_v21 = vpop.f32.mrb[0].mxu0 }
  0xf6   :  { %v563_v23 = vpop.f32.mrb[1].mxu0 }
  0xf7   :  { %v564_v24 = vadd.f32 %v563_v23, %v562_v21  ;;  %v565_v25 = vpop.f32.mrb[2].mxu0 }
  0xf8   :  { %v566_v26 = vpop.f32.mrb[3].mxu0 }
  0xf9   :  { %v212_v27 = vadd.f32 %v564_v24, %v517_v22  ;;  %v567_v28 = vadd.f32 %v566_v26, %v565_v25 }
  0xfb   :  { %v215_v29 = vadd.f32 %v567_v28, %v517_v22  ;;  %v218_v30 = vmax.f32 %v212_v27, 0.0 }
  0xfd   :  { %v219_v31 = vmax.f32 %v215_v29, 0.0 }
  0xff   :  { %v220_v32 = vpack.c.bf16 %v219_v31, %v218_v30 }
 0x101   :  { %579 = vmatmul.mubr.msk.bf16.vlgmr.msra.gmra.mrb[0].mxu1 %vm244_vm1, %v220_v32 }
 0x102   :  { %586 = vmatprep.mubr.msk.bf16.mxu1 %vm635_vm0, %v634_v19  ;;  %583 = vmatpush3.bf16.msra.mxu1 %v620_v33 }
 0x103   :  { %584 = vmatprep.subr.bf16.mxu1 %v634_v19 }
 0x106   :  { %585 = vmatpush3.bf16.msra.mxu1 %v621_v34 }
 0x1d4   :  { %v282_v37 = vpop.f32.mrb[0].mxu1 }
 0x1d5   :  { %v283_v38 = vadd.f32 %v536_v36, %v282_v37  ;;  %v580_v39 = vpop.f32.mrb[1].mxu1 }
 0x1d6   :  { %v285_v40 = vpop.f32.mrb[2].mxu1 }
 0x1d7   :  { %v286_v41 = vadd.f32 %v536_v36, %v285_v40  ;;  %v581_v42 = vpop.f32.mrb[3].mxu1  ;;  %v289_v43 = vmax.f32 %v283_v38, 0.0 }
 0x1d9   :  { %v290_v44 = vmax.f32 %v286_v41, 0.0 }
 0x1db   :  { %v291_v45 = vpack.c.bf16 %v290_v44, %v289_v43 }
 0x1dd   :  { %587 = vmatmul.mubr.msk.bf16.vlgmr.msra.gmra.mrb[4].mxu1 %vm244_vm1, %v291_v45 }
 0x2b0   :  { %v352_v48 = vpop.f32.mrb[4].mxu1 }
 0x2b1   :  { %v353_v49 = vadd.f32 %v540_v47, %v352_v48  ;;  %v588_v50 = vpop.f32.mrb[5].mxu1 }
 0x2b2   :  { %v355_v51 = vpop.f32.mrb[6].mxu1 }
 0x2b3   :  { %v356_v52 = vadd.f32 %v540_v47, %v355_v51  ;;  %v589_v53 = vpop.f32.mrb[7].mxu1  ;;  %v360_v54 = vsel %vm359_vm2, %v353_v49, -inf  ;;  %v404_v55 = vmul.f32 0.033, %v353_v49  ;;  %472 = vst [vmem:[%s839_s8] sm:$0xff] %v353_v49  ;;  %v408_v57 = vmul.f32 0.067, %v353_v49 }
 0x2b4   :  { %361 = vmax.xlane.f32.xlu0 %v360_v54 }
 0x2b5   :  { %v409_v56 = vmul.f32 0.067, %v356_v52  ;;  %432 = vrot.lane.b32.xlu1 %v404_v55, %s637_s1  ;;  %473 = vst [vmem:[%s839_s8 + $0x8] sm:$0xff] %v356_v52  ;;  %v363_v59 = vsel %vm359_vm2, %v356_v52, -inf  ;;  %v405_v60 = vmul.f32 0.033, %v356_v52 }
 0x2b6   :  { %v544_v62 = vclamps-f32 %v408_v57, 4.1351666 }
 0x2b7   :  { %v545_v58 = vclamps-f32 %v409_v56, 4.1351666 }
 0x2b8   :  { %364 = vmax.xlane.f32.xlu0 %v363_v59  ;;  %v416_v63 = vmul.f32 1.442695, %v544_v62 }
 0x2b9   :  { %v418_v61 = vmul.f32 1.442695, %v545_v58  ;;  %434 = vrot.lane.b32.xlu1 %v405_v60, %s637_s1 }
 0x2bb   :  { %622 = vpow2.f32 %v418_v61 }
 0x2bc   :  { %624 = vpow2.f32 %v416_v63 }
 0x2c5   :  { %v623_v0 = vpop.eup %622 }
 0x2c6   :  { %424 = vrot.lane.b32.xlu1 %v623_v0, %s638_s13  ;;  %v625_v1 = vpop.eup %624 }
 0x2ca   :  { %386 = vrot.lane.b32.xlu1 %v763_v35, %s639_s14 }
 0x2ce   :  { %422 = vrot.lane.b32.xlu0 %v625_v1, %s638_s13 }
 0x2d2   :  { %388 = vrot.lane.b32.xlu0 %v773_v46, %s639_s14 }
 0x327   :  { %v433_v5 = vpop.permute.xlu1 %432 }
 0x328   :  { %v438_v6 = vmul.f32 %v433_v5, %v402_v4 }
 0x32a   :  { %442 = vrot.lane.b32.xlu1 %v438_v6, %s639_s14 }
 0x32b   :  { %v435_v8 = vpop.permute.xlu1 %434 }
 0x32c   :  { %v439_v9 = vmul.f32 %v435_v8, %v403_v7 }
 0x32e   :  { %444 = vrot.lane.b32.xlu1 %v439_v9, %s639_s14 }
 0x338   :  { %v425_v23 = vpop.permute.xlu1 %424 }
 0x339   :  { %v429_v24 = vmul.f32 %v425_v23, %v403_v7 }
 0x33b   :  { %v451_v25 = vmul.f32 0.5, %v429_v24 }
 0x33c   :  { %v387_v26 = vpop.permute.xlu1 %386 }
 0x33d   :  { %v392_v28 = vadd.f32 %v387_v26, %v763_v35 }
 0x33f   :  { %v394_v31 = vmul.f32 0.5, %v392_v28 }
 0x341   :  { %v362_v10 = vpop.xlane.xlu0 %361 }
 0x342   :  { %v366_v11 = vsub.f32 %v353_v49, %v362_v10 }
 0x344   :  { %v368_v12 = vmul.f32 1.442695, %v366_v11 }
 0x345   :  { %v365_v13 = vpop.xlane.xlu0 %364 }
 0x346   :  { %626 = vpow2.f32 %v368_v12  ;;  %v367_v14 = vsub.f32 %v356_v52, %v365_v13 }
 0x348   :  { %v370_v15 = vmul.f32 1.442695, %v367_v14 }
 0x349   :  { %v423_v20 = vpop.permute.xlu0 %422 }
 0x34a   :  { %628 = vpow2.f32 %v370_v15  ;;  %v428_v21 = vmul.f32 %v423_v20, %v402_v4 }
 0x34c   :  { %v450_v22 = vmul.f32 0.5, %v428_v21 }
 0x34d   :  { %v389_v29 = vpop.permute.xlu0 %388 }
 0x34e   :  { %v393_v32 = vadd.f32 %v389_v29, %v773_v46 }
 0x350   :  { %v627_v16 = vpop.eup %626  ;;  %v395_v36 = vmul.f32 0.5, %v393_v32 }
 0x351   :  { %v372_v17 = vsel %vm359_vm2, %v627_v16, 0.0 }
 0x352   :  { %373 = vadd.xlane.f32.xlu1 %v372_v17 }
 0x354   :  { %v629_v18 = vpop.eup %628 }
 0x355   :  { %v375_v19 = vsel %vm359_vm2, %v629_v18, 0.0 }
 0x356   :  { %376 = vadd.xlane.f32.xlu0 %v375_v19 }
 0x363   :  { %454 = vrot.lane.b32.xlu1 %v450_v22, %s639_s14 }
 0x36c   :  { %456 = vrot.lane.b32.xlu0 %v451_v25, %s639_s14 }
 0x39c   :  { %v443_v27 = vpop.permute.xlu1 %442 }
 0x39d   :  { %v448_v34 = vadd.f32 %v443_v27, %v394_v31 }
 0x3a0   :  { %v445_v30 = vpop.permute.xlu1 %444 }
 0x3a1   :  { %v449_v40 = vadd.f32 %v445_v30, %v395_v36 }
 0x3df   :  { %v374_v33 = vpop.xlane.xlu1 %373 }
 0x3e0   :  { %630 = vrcp.f32 %v374_v33 }
 0x3e3   :  { %v455_v37 = vpop.permute.xlu1 %454  ;;  %v377_v38 = vpop.xlane.xlu0 %376 }
 0x3e4   :  { %v460_v39 = vsub.f32 %v448_v34, %v455_v37  ;;  %632 = vrcp.f32 %v377_v38  ;;  %v466_v44 = vadd.f32 %v455_v37, %v448_v34 }
 0x3e6   :  { %v462_v41 = vmax.f32 %v460_v39, 0.0  ;;  %v468_v46 = vmax.f32 %v466_v44, 0.0 }
 0x3e7   :  { %v457_v42 = vpop.permute.xlu0 %456 }
 0x3e8   :  { %v464_v43 = vmin.f32 %v462_v41, 64.0  ;;  %v461_v45 = vsub.f32 %v449_v40, %v457_v42  ;;  %v467_v50 = vadd.f32 %v457_v42, %v449_v40  ;;  %v470_v53 = vmin.f32 %v468_v46, 64.0 }
 0x3ea   :  { %v631_v35 = vpop.eup %630  ;;  %v463_v47 = vmax.f32 %v461_v45, 0.0  ;;  %487 = vrot.lane.b32.xlu1 %v464_v43, %s640_s15  ;;  %v469_v54 = vmax.f32 %v467_v50, 0.0 }
 0x3eb   :  { %v379_v48 = vmul.f32 %v631_v35, %v627_v16 }
 0x3ec   :  { %v465_v49 = vmin.f32 %v463_v47, 64.0  ;;  %v471_v55 = vmin.f32 %v469_v54, 64.0 }
 0x3ee   :  { %v633_v51 = vpop.eup %632  ;;  %476 = vrot.lane.b32.xlu1 %v379_v48, %s641_s16  ;;  %489 = vrot.lane.b32.xlu0 %v465_v49, %s640_s15 }
 0x3ef   :  { %v381_v52 = vmul.f32 %v633_v51, %v629_v18 }
 0x3f2   :  { %501 = vrot.lane.b32.xlu1 %v470_v53, %s642_s17  ;;  %478 = vrot.lane.b32.xlu0 %v381_v52, %s641_s16 }
 0x3f6   :  { %503 = vrot.lane.b32.xlu0 %v471_v55, %s642_s17 }
 0x45c   :  { %v488_v56 = vpop.permute.xlu1 %487 }
 0x460   :  { %v477_v57 = vpop.permute.xlu1 %476  ;;  %v490_v58 = vpop.permute.xlu0 %489 }
 0x461   :  { %483 = vst.msk [vmem:[%s839_s8] sm:$0xff] %vm482_vm3, %v477_v57 }
 0x462   :  { %494 = vst.msk [vmem:[%s839_s8] sm:$0xff] %vm493_vm4, %v488_v56 }
 0x463   :  { %497 = vst.msk [vmem:[%s839_s8] sm:$0xff] %vm496_vm5, %v488_v56 }
 0x464   :  { %v502_v59 = vpop.permute.xlu1 %501  ;;  %v479_v60 = vpop.permute.xlu0 %478 }
 0x465   :  { %508 = vst.msk [vmem:[%s839_s8] sm:$0xff] %vm507_vm6, %v502_v59 }
 0x466   :  { %484 = vst.msk [vmem:[%s839_s8 + $0x8] sm:$0xff] %vm482_vm3, %v479_v60 }
 0x467   :  { %511 = vst.msk [vmem:[%s839_s8] sm:$0xff] %vm510_vm7, %v502_v59 }
 0x468   :  { %495 = vst.msk [vmem:[%s839_s8 + $0x8] sm:$0xff] %vm493_vm4, %v490_v58  ;;  %v504_v61 = vpop.permute.xlu0 %503 }
 0x469   :  { %498 = vst.msk [vmem:[%s839_s8 + $0x8] sm:$0xff] %vm496_vm5, %v490_v58 }
 0x46a   :  { %509 = vst.msk [vmem:[%s839_s8 + $0x8] sm:$0xff] %vm507_vm6, %v504_v61 }
 0x46b   :  { %512 = vst.msk [vmem:[%s839_s8 + $0x8] sm:$0xff] %vm510_vm7, %v504_v61 }

</bundles_post_ra>
